<compile_context>
chip_gen: v5e
topology: v5e:2x2
jax: 0.10.0
libtpu: 0.0.40
codegen_flags: <defaults>
</compile_context>

<pallas_src>
import math
from functools import partial

import jax
import jax.numpy as jnp
from jax.experimental import pallas as pl
from jax.experimental.pallas import tpu as pltpu


# ----------------------------- helpers --------------------------------------

def _pick_tile(dim, target, align):
    """Largest tile <= target that divides dim and is a multiple of `align`.
    Falls back to the full dim (always a legal block)."""
    if dim <= target:
        return dim
    for t in range(min(target, dim), 0, -1):
        if dim % t == 0 and t % align == 0:
            return t
    return dim


def _ln_f32(xv, g, b, eps=1e-5):
    """Row LayerNorm in f32. xv: (M, D) f32, g/b: (1, D) f32."""
    mu = jnp.mean(xv, axis=-1, keepdims=True)
    xc = xv - mu
    var = jnp.mean(xc * xc, axis=-1, keepdims=True)
    return (xc * jax.lax.rsqrt(var + eps)) * g + b


def _attend_heads(q, k, v, n_heads, causal):
    """All-heads attention inside a kernel. q:(S,D), k/v:(Sk,D) bf16 -> (S,D) f32.
    Static unrolled head loop; per-head scores in f32, softmax in f32."""
    S, D = q.shape
    Sk = k.shape[0]
    Dh = D // n_heads
    scale = 1.0 / math.sqrt(Dh)
    if causal:
        row = jax.lax.broadcasted_iota(jnp.int32, (S, Sk), 0)
        col = jax.lax.broadcasted_iota(jnp.int32, (S, Sk), 1)
        neg = jnp.where(col > row, jnp.float32(-1e30), jnp.float32(0.0))
    outs = []
    for h in range(n_heads):                         # static unrolled head loop
        sl = slice(h * Dh, (h + 1) * Dh)
        s = jax.lax.dot_general(q[:, sl], k[:, sl],
                                (((1,), (1,)), ((), ())),   # q @ k^T on the MXU
                                preferred_element_type=jnp.float32) * scale
        if causal:
            s = s + neg
        m = jnp.max(s, axis=-1, keepdims=True)
        p = jnp.exp(s - m)
        l = jnp.sum(p, axis=-1, keepdims=True)
        p = p * pl.reciprocal(l, approx=True)        # EUP slot, ~free
        outs.append(jnp.dot(p.astype(jnp.bfloat16), v[:, sl],
                            preferred_element_type=jnp.float32))
    return jnp.concatenate(outs, axis=-1)            # (S, D) f32, lane-dense


# ----------------------------- fused kernels --------------------------------

def self_attn_block(x, g, b, wqkv, bqkv, wo, bo, n_heads):
    """x + OutProj(CausalMHA(LN1(x))) fused in one kernel, grid over batch.
    x:(B,S,D) bf16, wqkv:(D,3D), wo:(D,D)."""
    B, S, D = x.shape
    g2 = g.reshape(1, D).astype(jnp.float32)
    b2 = b.reshape(1, D).astype(jnp.float32)
    bqkv2 = bqkv.reshape(1, 3 * D).astype(jnp.float32)
    bo2 = bo.reshape(1, D).astype(jnp.float32)

    def kernel(x_ref, g_ref, b_ref, wqkv_ref, bqkv_ref, wo_ref, bo_ref, o_ref):
        xv = x_ref[0].astype(jnp.float32)                                  # (S, D)
        y = _ln_f32(xv, g_ref[...], b_ref[...])
        qkv = (jnp.dot(y.astype(jnp.bfloat16), wqkv_ref[...],
                       preferred_element_type=jnp.float32) + bqkv_ref[...]
               ).astype(jnp.bfloat16)                                      # (S, 3D)
        a = _attend_heads(qkv[:, :D], qkv[:, D:2 * D], qkv[:, 2 * D:],
                          n_heads, causal=True)
        proj = jnp.dot(a.astype(jnp.bfloat16), wo_ref[...],
                       preferred_element_type=jnp.float32) + bo_ref[...]
        o_ref[0] = (xv + proj).astype(o_ref.dtype)

    return pl.pallas_call(
        kernel,
        out_shape=jax.ShapeDtypeStruct((B, S, D), jnp.bfloat16),
        grid=(B,),
        in_specs=[
            pl.BlockSpec((1, S, D), lambda bi: (bi, 0, 0)),
            pl.BlockSpec((1, D), lambda bi: (0, 0)),
            pl.BlockSpec((1, D), lambda bi: (0, 0)),
            pl.BlockSpec((D, 3 * D), lambda bi: (0, 0)),   # resident weights
            pl.BlockSpec((1, 3 * D), lambda bi: (0, 0)),
            pl.BlockSpec((D, D), lambda bi: (0, 0)),
            pl.BlockSpec((1, D), lambda bi: (0, 0)),
        ],
        out_specs=pl.BlockSpec((1, S, D), lambda bi: (bi, 0, 0)),
        compiler_params=pltpu.CompilerParams(dimension_semantics=("parallel",)),
    )(x.astype(jnp.bfloat16), g2, b2, wqkv.astype(jnp.bfloat16), bqkv2,
      wo.astype(jnp.bfloat16), bo2)


def cross_attn_block(x, mem, g, b, wq, bq, wkv, bkv, wo, bo, n_heads):
    """x + OutProj(MHA(LN2(x), memory)) fused in one kernel, grid over batch.
    x:(B,S,D), mem:(B,Se,D) bf16, wq:(D,D), wkv:(D,2D), wo:(D,D). Memory is NOT
    layer-normed (matches PyTorch norm_first decoder layer)."""
    B, S, D = x.shape
    Se = mem.shape[1]
    g2 = g.reshape(1, D).astype(jnp.float32)
    b2 = b.reshape(1, D).astype(jnp.float32)
    bq2 = bq.reshape(1, D).astype(jnp.float32)
    bkv2 = bkv.reshape(1, 2 * D).astype(jnp.float32)
    bo2 = bo.reshape(1, D).astype(jnp.float32)

    def kernel(x_ref, m_ref, g_ref, b_ref, wq_ref, bq_ref, wkv_ref, bkv_ref,
               wo_ref, bo_ref, o_ref):
        xv = x_ref[0].astype(jnp.float32)                                  # (S, D)
        y = _ln_f32(xv, g_ref[...], b_ref[...])
        q = (jnp.dot(y.astype(jnp.bfloat16), wq_ref[...],
                     preferred_element_type=jnp.float32) + bq_ref[...]
             ).astype(jnp.bfloat16)                                        # (S, D)
        kv = (jnp.dot(m_ref[0], wkv_ref[...],
                      preferred_element_type=jnp.float32) + bkv_ref[...]
              ).astype(jnp.bfloat16)                                       # (Se, 2D)
        a = _attend_heads(q, kv[:, :D], kv[:, D:], n_heads, causal=False)
        proj = jnp.dot(a.astype(jnp.bfloat16), wo_ref[...],
                       preferred_element_type=jnp.float32) + bo_ref[...]
        o_ref[0] = (xv + proj).astype(o_ref.dtype)

    return pl.pallas_call(
        kernel,
        out_shape=jax.ShapeDtypeStruct((B, S, D), jnp.bfloat16),
        grid=(B,),
        in_specs=[
            pl.BlockSpec((1, S, D), lambda bi: (bi, 0, 0)),
            pl.BlockSpec((1, Se, D), lambda bi: (bi, 0, 0)),
            pl.BlockSpec((1, D), lambda bi: (0, 0)),
            pl.BlockSpec((1, D), lambda bi: (0, 0)),
            pl.BlockSpec((D, D), lambda bi: (0, 0)),       # resident weights
            pl.BlockSpec((1, D), lambda bi: (0, 0)),
            pl.BlockSpec((D, 2 * D), lambda bi: (0, 0)),
            pl.BlockSpec((1, 2 * D), lambda bi: (0, 0)),
            pl.BlockSpec((D, D), lambda bi: (0, 0)),
            pl.BlockSpec((1, D), lambda bi: (0, 0)),
        ],
        out_specs=pl.BlockSpec((1, S, D), lambda bi: (bi, 0, 0)),
        compiler_params=pltpu.CompilerParams(dimension_semantics=("parallel",)),
    )(x.astype(jnp.bfloat16), mem.astype(jnp.bfloat16), g2, b2,
      wq.astype(jnp.bfloat16), bq2, wkv.astype(jnp.bfloat16), bkv2,
      wo.astype(jnp.bfloat16), bo2)


def ffn_block(x, g, b, w1, b1, w2, b2):
    """y = x + relu(LayerNorm(x) @ w1 + b1) @ w2 + b2, fused, grid over M tiles."""
    M, D = x.shape
    F = w1.shape[1]
    tm = _pick_tile(M, 256, 8)
    g2 = g.reshape(1, D).astype(jnp.float32)
    be2 = b.reshape(1, D).astype(jnp.float32)
    b1r = b1.reshape(1, F).astype(jnp.float32)
    b2r = b2.reshape(1, D).astype(jnp.float32)

    def kernel(x_ref, g_ref, be_ref, w1_ref, b1_ref, w2_ref, b2_ref, o_ref):
        xv = x_ref[...].astype(jnp.float32)
        y = _ln_f32(xv, g_ref[...], be_ref[...])
        h = jnp.dot(y.astype(jnp.bfloat16), w1_ref[...],
                    preferred_element_type=jnp.float32) + b1_ref[...]
        h = jnp.maximum(h, 0.0)
        out = jnp.dot(h.astype(jnp.bfloat16), w2_ref[...],
                      preferred_element_type=jnp.float32) + b2_ref[...]
        o_ref[...] = (xv + out).astype(o_ref.dtype)

    return pl.pallas_call(
        kernel,
        out_shape=jax.ShapeDtypeStruct((M, D), jnp.bfloat16),
        grid=(M // tm,),
        in_specs=[
            pl.BlockSpec((tm, D), lambda i: (i, 0)),
            pl.BlockSpec((1, D), lambda i: (0, 0)),
            pl.BlockSpec((1, D), lambda i: (0, 0)),
            pl.BlockSpec((D, F), lambda i: (0, 0)),    # resident weights
            pl.BlockSpec((1, F), lambda i: (0, 0)),
            pl.BlockSpec((F, D), lambda i: (0, 0)),
            pl.BlockSpec((1, D), lambda i: (0, 0)),
        ],
        out_specs=pl.BlockSpec((tm, D), lambda i: (i, 0)),
        compiler_params=pltpu.CompilerParams(dimension_semantics=("parallel",)),
    )(x.astype(jnp.bfloat16), g2, be2,
      w1.astype(jnp.bfloat16), b1r, w2.astype(jnp.bfloat16), b2r)


def ln_tied_logits(x, g, b, emb):
    """logits = LayerNorm(x) @ emb^T without materializing emb.T:
    contracts x (M,D) against emb (V,D) on the D axis, tiled over (M, vocab)."""
    M, D = x.shape
    V = emb.shape[0]
    tm = _pick_tile(M, 256, 8)
    tv = _pick_tile(V, 512, 128)
    g2 = g.reshape(1, D).astype(jnp.float32)
    b2 = b.reshape(1, D).astype(jnp.float32)

    def kernel(x_ref, g_ref, b_ref, e_ref, o_ref):
        y = _ln_f32(x_ref[...].astype(jnp.float32), g_ref[...], b_ref[...])
        o_ref[...] = jax.lax.dot_general(
            y.astype(jnp.bfloat16), e_ref[...],
            (((1,), (1,)), ((), ())),                  # contract on D (A @ B^T on MXU)
            preferred_element_type=jnp.float32).astype(o_ref.dtype)

    return pl.pallas_call(
        kernel,
        out_shape=jax.ShapeDtypeStruct((M, V), jnp.float32),
        grid=(M // tm, V // tv),
        in_specs=[
            pl.BlockSpec((tm, D), lambda i, j: (i, 0)),
            pl.BlockSpec((1, D), lambda i, j: (0, 0)),
            pl.BlockSpec((1, D), lambda i, j: (0, 0)),
            pl.BlockSpec((tv, D), lambda i, j: (j, 0)),
        ],
        out_specs=pl.BlockSpec((tm, tv), lambda i, j: (i, j)),
        compiler_params=pltpu.CompilerParams(
            dimension_semantics=("parallel", "parallel")),
    )(x.astype(jnp.bfloat16), g2, b2, emb.astype(jnp.bfloat16))


# ----------------------------- Parameters ----------------------------------

def init_params(key, vocab, d_model, n_layers, d_ff):
    keys = jax.random.split(key, 2 + n_layers)
    d = d_model

    def lin(k, fi, fo):
        return (jax.random.normal(k, (fi, fo), jnp.float32) / math.sqrt(fi)
                ).astype(jnp.bfloat16)

    emb = (jax.random.normal(keys[0], (vocab, d), jnp.float32) / math.sqrt(d)
           ).astype(jnp.bfloat16)
    mask_token = jax.random.normal(keys[1], (d,), jnp.float32) / math.sqrt(d)  # training-only

    layers = []
    for li in range(n_layers):
        lk = jax.random.split(keys[2 + li], 10)
        layers.append(dict(
            # fused self-attention QKV (D, 3D) and cross-attention KV (D, 2D)
            wqkv_s=jnp.concatenate([lin(lk[0], d, d), lin(lk[1], d, d), lin(lk[2], d, d)], axis=1),
            bqkv_s=jnp.zeros(3 * d, jnp.float32),
            wo_s=lin(lk[3], d, d), bo_s=jnp.zeros(d, jnp.float32),
            wq_c=lin(lk[4], d, d), bq_c=jnp.zeros(d, jnp.float32),
            wkv_c=jnp.concatenate([lin(lk[5], d, d), lin(lk[6], d, d)], axis=1),
            bkv_c=jnp.zeros(2 * d, jnp.float32),
            wo_c=lin(lk[7], d, d), bo_c=jnp.zeros(d, jnp.float32),
            w1=lin(lk[8], d, d_ff), b1=jnp.zeros(d_ff, jnp.float32),
            w2=lin(lk[9], d_ff, d), b2=jnp.zeros(d, jnp.float32),
            n1_g=jnp.ones(d, jnp.float32), n1_b=jnp.zeros(d, jnp.float32),
            n2_g=jnp.ones(d, jnp.float32), n2_b=jnp.zeros(d, jnp.float32),
            n3_g=jnp.ones(d, jnp.float32), n3_b=jnp.zeros(d, jnp.float32),
        ))

    return dict(emb=emb, mask_token=mask_token, layers=layers,
                ln_g=jnp.ones(d, jnp.float32), ln_b=jnp.zeros(d, jnp.float32))


def positional_encoding(seq_len, d_model):
    position = jnp.arange(seq_len, dtype=jnp.float32)[:, None]
    div_term = jnp.exp(jnp.arange(0, d_model, 2, dtype=jnp.float32)
                       * (-math.log(10000.0) / d_model))
    pe = jnp.zeros((seq_len, d_model), jnp.float32)
    pe = pe.at[:, 0::2].set(jnp.sin(position * div_term))
    pe = pe.at[:, 1::2].set(jnp.cos(position * div_term))
    return pe[None]   # (1, S, D)


# ----------------------------- Forward pass ---------------------------------

@partial(jax.jit, static_argnames="n_heads")
def token_decoder_forward(params, tokens, x_enc, n_heads):
    """tokens: (B, S) int32, x_enc: (B, Se, D) -> logits (B, S, vocab) f32."""
    B, S = tokens.shape
    _, Se, D = x_enc.shape
    emb = params["emb"]
    vocab = emb.shape[0]

    # token embedding + positional encoding (glue in plain JAX); bf16 activations.
    x = (jnp.take(emb, tokens, axis=0).astype(jnp.float32)
         + positional_encoding(S, D)).astype(jnp.bfloat16)          # (B, S, D)
    mem = x_enc.astype(jnp.bfloat16)                                # (B, Se, D)

    for L in params["layers"]:
        # --- self-attention block (pre-norm, causal, fully fused) ---
        x = self_attn_block(x, L["n1_g"], L["n1_b"], L["wqkv_s"], L["bqkv_s"],
                            L["wo_s"], L["bo_s"], n_heads)

        # --- cross-attention block (pre-norm on tgt, fused KV on raw memory) ---
        x = cross_attn_block(x, mem, L["n2_g"], L["n2_b"], L["wq_c"], L["bq_c"],
                             L["wkv_c"], L["bkv_c"], L["wo_c"], L["bo_c"], n_heads)

        # --- feed-forward block (pre-norm, fused LN + W1 + ReLU + W2 + residual) ---
        x = ffn_block(x.reshape(B * S, D), L["n3_g"], L["n3_b"],
                      L["w1"], L["b1"], L["w2"], L["b2"]).reshape(B, S, D)

    # final LayerNorm + tied output projection (contract on D, no emb.T materialized)
    logits = ln_tied_logits(x.reshape(B * S, D), params["ln_g"], params["ln_b"], emb)
    return logits.reshape(B, S, vocab)


# ----------------------------- Main ------------------------------------------

if __name__ == "__main__":
    vocab, d_model, n_layers, n_heads = 64, 32, 2, 4
    d_ff = 4 * d_model
    B, S, Se = 2, 8, 8

    key = jax.random.PRNGKey(0)
    kp, kt, ke = jax.random.split(key, 3)

    params = init_params(kp, vocab, d_model, n_layers, d_ff)
    tokens = jax.random.randint(kt, (B, S), 0, vocab, dtype=jnp.int32)
    x_enc = jax.random.normal(ke, (B, Se, d_model), jnp.float32)

    out = token_decoder_forward(params, tokens, x_enc, n_heads)
    out = jax.block_until_ready(out)

    assert out.shape == (B, S, vocab), out.shape
    assert bool(jnp.all(jnp.isfinite(out)))
    print("KERNEL_OK")
</pallas_src>

<mosaic_0001>
module attributes {stable_mosaic.version = 11 : i64} {
  func.func @kernel(%arg0: i32, %arg1: memref<16x32xbf16, #tpu.memory_space<vmem>>, %arg2: memref<1x32xf32, #tpu.memory_space<vmem>>, %arg3: memref<1x32xf32, #tpu.memory_space<vmem>>, %arg4: memref<32x128xbf16, #tpu.memory_space<vmem>>, %arg5: memref<1x128xf32, #tpu.memory_space<vmem>>, %arg6: memref<128x32xbf16, #tpu.memory_space<vmem>>, %arg7: memref<1x32xf32, #tpu.memory_space<vmem>>, %arg8: memref<16x32xbf16, #tpu.memory_space<vmem>>) attributes {dimension_semantics = [#tpu.dimension_semantics<parallel>], iteration_bounds = array<i64: 1>, scalar_prefetch = 0 : i64, scratch_operands = 0 : i64, tpu.core_type = #tpu.core_type<tc>, window_params = [{transform_indices = @transform_0, window_bounds = array<i64: 16, 32>}, {pipeline_mode = #tpu.pipeline_mode<synchronous>, transform_indices = @transform_1, window_bounds = array<i64: 1, 32>}, {pipeline_mode = #tpu.pipeline_mode<synchronous>, transform_indices = @transform_2, window_bounds = array<i64: 1, 32>}, {pipeline_mode = #tpu.pipeline_mode<synchronous>, transform_indices = @transform_3, window_bounds = array<i64: 32, 128>}, {pipeline_mode = #tpu.pipeline_mode<synchronous>, transform_indices = @transform_4, window_bounds = array<i64: 1, 128>}, {pipeline_mode = #tpu.pipeline_mode<synchronous>, transform_indices = @transform_5, window_bounds = array<i64: 128, 32>}, {pipeline_mode = #tpu.pipeline_mode<synchronous>, transform_indices = @transform_6, window_bounds = array<i64: 1, 32>}, {transform_indices = @transform_7, window_bounds = array<i64: 16, 32>}]} {
    %c0 = arith.constant 0 : index
    %c0_0 = arith.constant 0 : index
    %0 = vector.load %arg1[%c0, %c0_0] : memref<16x32xbf16, #tpu.memory_space<vmem>>, vector<16x32xbf16>
    %1 = arith.extf %0 : vector<16x32xbf16> to vector<16x32xf32>
    %c0_1 = arith.constant 0 : index
    %c0_2 = arith.constant 0 : index
    %2 = vector.load %arg2[%c0_1, %c0_2] : memref<1x32xf32, #tpu.memory_space<vmem>>, vector<1x32xf32>
    %c0_3 = arith.constant 0 : index
    %c0_4 = arith.constant 0 : index
    %3 = vector.load %arg3[%c0_3, %c0_4] : memref<1x32xf32, #tpu.memory_space<vmem>>, vector<1x32xf32>
    %cst = arith.constant dense<0.000000e+00> : vector<16xf32>
    %4 = vector.multi_reduction <add>, %1, %cst [1] : vector<16x32xf32> to vector<16xf32>
    %5 = vector.shape_cast %4 : vector<16xf32> to vector<16x1xf32>
    %cst_5 = arith.constant 3.200000e+01 : f32
    %6 = vector.broadcast %cst_5 : f32 to vector<16x1xf32>
    %7 = arith.divf %5, %6 : vector<16x1xf32>
    %8 = vector.broadcast %7 : vector<16x1xf32> to vector<16x32xf32>
    %9 = arith.subf %1, %8 : vector<16x32xf32>
    %10 = arith.mulf %9, %9 : vector<16x32xf32>
    %cst_6 = arith.constant dense<0.000000e+00> : vector<16xf32>
    %11 = vector.multi_reduction <add>, %10, %cst_6 [1] : vector<16x32xf32> to vector<16xf32>
    %12 = vector.shape_cast %11 : vector<16xf32> to vector<16x1xf32>
    %cst_7 = arith.constant 3.200000e+01 : f32
    %13 = vector.broadcast %cst_7 : f32 to vector<16x1xf32>
    %14 = arith.divf %12, %13 : vector<16x1xf32>
    %cst_8 = arith.constant 9.99999974E-6 : f32
    %15 = vector.broadcast %cst_8 : f32 to vector<16x1xf32>
    %16 = arith.addf %14, %15 : vector<16x1xf32>
    %17 = math.rsqrt %16 : vector<16x1xf32>
    %18 = vector.broadcast %17 : vector<16x1xf32> to vector<16x32xf32>
    %19 = arith.mulf %9, %18 : vector<16x32xf32>
    %20 = vector.broadcast %2 : vector<1x32xf32> to vector<16x32xf32>
    %21 = arith.mulf %19, %20 : vector<16x32xf32>
    %22 = vector.broadcast %3 : vector<1x32xf32> to vector<16x32xf32>
    %23 = arith.addf %21, %22 : vector<16x32xf32>
    %24 = arith.truncf %23 : vector<16x32xf32> to vector<16x32xbf16>
    %c0_9 = arith.constant 0 : index
    %c0_10 = arith.constant 0 : index
    %25 = vector.load %arg4[%c0_9, %c0_10] : memref<32x128xbf16, #tpu.memory_space<vmem>>, vector<32x128xbf16>
    %cst_11 = arith.constant dense<0.000000e+00> : vector<16x128xf32>
    %26 = tpu.matmul %24, %25, %cst_11 {dimension_numbers = #tpu.dot_dimension_numbers<[1], [0], [0], [1], [0, 0, 1, 1], [], []>} : vector<16x32xbf16>, vector<32x128xbf16>, vector<16x128xf32> -> vector<16x128xf32>
    %c0_12 = arith.constant 0 : index
    %c0_13 = arith.constant 0 : index
    %27 = vector.load %arg5[%c0_12, %c0_13] : memref<1x128xf32, #tpu.memory_space<vmem>>, vector<1x128xf32>
    %28 = vector.broadcast %27 : vector<1x128xf32> to vector<16x128xf32>
    %29 = arith.addf %26, %28 : vector<16x128xf32>
    %cst_14 = arith.constant 0.000000e+00 : f32
    %30 = vector.broadcast %cst_14 : f32 to vector<16x128xf32>
    %31 = arith.maximumf %29, %30 : vector<16x128xf32>
    %32 = arith.truncf %31 : vector<16x128xf32> to vector<16x128xbf16>
    %c0_15 = arith.constant 0 : index
    %c0_16 = arith.constant 0 : index
    %33 = vector.load %arg6[%c0_15, %c0_16] : memref<128x32xbf16, #tpu.memory_space<vmem>>, vector<128x32xbf16>
    %cst_17 = arith.constant dense<0.000000e+00> : vector<16x32xf32>
    %34 = tpu.matmul %32, %33, %cst_17 {dimension_numbers = #tpu.dot_dimension_numbers<[1], [0], [0], [1], [0, 0, 1, 1], [], []>} : vector<16x128xbf16>, vector<128x32xbf16>, vector<16x32xf32> -> vector<16x32xf32>
    %c0_18 = arith.constant 0 : index
    %c0_19 = arith.constant 0 : index
    %35 = vector.load %arg7[%c0_18, %c0_19] : memref<1x32xf32, #tpu.memory_space<vmem>>, vector<1x32xf32>
    %36 = vector.broadcast %35 : vector<1x32xf32> to vector<16x32xf32>
    %37 = arith.addf %34, %36 : vector<16x32xf32>
    %38 = arith.addf %1, %37 : vector<16x32xf32>
    %39 = arith.truncf %38 : vector<16x32xf32> to vector<16x32xbf16>
    %c0_20 = arith.constant 0 : index
    %c0_21 = arith.constant 0 : index
    %40 = vector.load %arg8[%c0_20, %c0_21] : memref<16x32xbf16, #tpu.memory_space<vmem>>, vector<16x32xbf16>
    tpu.vector_store %arg8[%c0_20, %c0_21], %39 {strides = array<i32>} : memref<16x32xbf16, #tpu.memory_space<vmem>>, vector<16x32xbf16>,
    return
  }
  func.func @transform_0(%arg0: i32) -> (i32, i32) {
    %c0_i32 = arith.constant 0 : i32
    %c0_i32_0 = arith.constant 0 : i32
    return %arg0, %c0_i32 : i32, i32
  }
  func.func @transform_1(%arg0: i32) -> (i32, i32) {
    %c0_i32 = arith.constant 0 : i32
    %c0_i32_0 = arith.constant 0 : i32
    %c0_i32_1 = arith.constant 0 : i32
    return %c0_i32, %c0_i32_0 : i32, i32
  }
  func.func @transform_2(%arg0: i32) -> (i32, i32) {
    %c0_i32 = arith.constant 0 : i32
    %c0_i32_0 = arith.constant 0 : i32
    %c0_i32_1 = arith.constant 0 : i32
    return %c0_i32, %c0_i32_0 : i32, i32
  }
  func.func @transform_3(%arg0: i32) -> (i32, i32) {
    %c0_i32 = arith.constant 0 : i32
    %c0_i32_0 = arith.constant 0 : i32
    %c0_i32_1 = arith.constant 0 : i32
    return %c0_i32, %c0_i32_0 : i32, i32
  }
  func.func @transform_4(%arg0: i32) -> (i32, i32) {
    %c0_i32 = arith.constant 0 : i32
    %c0_i32_0 = arith.constant 0 : i32
    %c0_i32_1 = arith.constant 0 : i32
    return %c0_i32, %c0_i32_0 : i32, i32
  }
  func.func @transform_5(%arg0: i32) -> (i32, i32) {
    %c0_i32 = arith.constant 0 : i32
    %c0_i32_0 = arith.constant 0 : i32
    %c0_i32_1 = arith.constant 0 : i32
    return %c0_i32, %c0_i32_0 : i32, i32
  }
  func.func @transform_6(%arg0: i32) -> (i32, i32) {
    %c0_i32 = arith.constant 0 : i32
    %c0_i32_0 = arith.constant 0 : i32
    %c0_i32_1 = arith.constant 0 : i32
    return %c0_i32, %c0_i32_0 : i32, i32
  }
  func.func @transform_7(%arg0: i32) -> (i32, i32) {
    %c0_i32 = arith.constant 0 : i32
    %c0_i32_0 = arith.constant 0 : i32
    return %arg0, %c0_i32 : i32, i32
  }
}

module attributes {stable_mosaic.version = 11 : i64} {
  func.func @kernel(%arg0: i32, %arg1: memref<1x8x32xbf16, #tpu.memory_space<vmem>>, %arg2: memref<1x8x32xbf16, #tpu.memory_space<vmem>>, %arg3: memref<1x32xf32, #tpu.memory_space<vmem>>, %arg4: memref<1x32xf32, #tpu.memory_space<vmem>>, %arg5: memref<32x32xbf16, #tpu.memory_space<vmem>>, %arg6: memref<1x32xf32, #tpu.memory_space<vmem>>, %arg7: memref<32x64xbf16, #tpu.memory_space<vmem>>, %arg8: memref<1x64xf32, #tpu.memory_space<vmem>>, %arg9: memref<32x32xbf16, #tpu.memory_space<vmem>>, %arg10: memref<1x32xf32, #tpu.memory_space<vmem>>, %arg11: memref<1x8x32xbf16, #tpu.memory_space<vmem>>) attributes {dimension_semantics = [#tpu.dimension_semantics<parallel>], iteration_bounds = array<i64: 2>, scalar_prefetch = 0 : i64, scratch_operands = 0 : i64, tpu.core_type = #tpu.core_type<tc>, window_params = [{transform_indices = @transform_0, window_bounds = array<i64: 1, 8, 32>}, {transform_indices = @transform_1, window_bounds = array<i64: 1, 8, 32>}, {pipeline_mode = #tpu.pipeline_mode<synchronous>, transform_indices = @transform_2, window_bounds = array<i64: 1, 32>}, {pipeline_mode = #tpu.pipeline_mode<synchronous>, transform_indices = @transform_3, window_bounds = array<i64: 1, 32>}, {pipeline_mode = #tpu.pipeline_mode<synchronous>, transform_indices = @transform_4, window_bounds = array<i64: 32, 32>}, {pipeline_mode = #tpu.pipeline_mode<synchronous>, transform_indices = @transform_5, window_bounds = array<i64: 1, 32>}, {pipeline_mode = #tpu.pipeline_mode<synchronous>, transform_indices = @transform_6, window_bounds = array<i64: 32, 64>}, {pipeline_mode = #tpu.pipeline_mode<synchronous>, transform_indices = @transform_7, window_bounds = array<i64: 1, 64>}, {pipeline_mode = #tpu.pipeline_mode<synchronous>, transform_indices = @transform_8, window_bounds = array<i64: 32, 32>}, {pipeline_mode = #tpu.pipeline_mode<synchronous>, transform_indices = @transform_9, window_bounds = array<i64: 1, 32>}, {transform_indices = @transform_10, window_bounds = array<i64: 1, 8, 32>}]} {
    %c0 = arith.constant 0 : index
    %c0_0 = arith.constant 0 : index
    %c0_1 = arith.constant 0 : index
    %0 = vector.load %arg1[%c0, %c0_0, %c0_1] : memref<1x8x32xbf16, #tpu.memory_space<vmem>>, vector<1x8x32xbf16>
    %1 = vector.shape_cast %0 : vector<1x8x32xbf16> to vector<8x32xbf16>
    %2 = arith.extf %1 : vector<8x32xbf16> to vector<8x32xf32>
    %c0_2 = arith.constant 0 : index
    %c0_3 = arith.constant 0 : index
    %3 = vector.load %arg3[%c0_2, %c0_3] : memref<1x32xf32, #tpu.memory_space<vmem>>, vector<1x32xf32>
    %c0_4 = arith.constant 0 : index
    %c0_5 = arith.constant 0 : index
    %4 = vector.load %arg4[%c0_4, %c0_5] : memref<1x32xf32, #tpu.memory_space<vmem>>, vector<1x32xf32>
    %cst = arith.constant dense<0.000000e+00> : vector<8xf32>
    %5 = vector.multi_reduction <add>, %2, %cst [1] : vector<8x32xf32> to vector<8xf32>
    %6 = vector.shape_cast %5 : vector<8xf32> to vector<8x1xf32>
    %cst_6 = arith.constant 3.200000e+01 : f32
    %7 = vector.broadcast %cst_6 : f32 to vector<8x1xf32>
    %8 = arith.divf %6, %7 : vector<8x1xf32>
    %9 = vector.broadcast %8 : vector<8x1xf32> to vector<8x32xf32>
    %10 = arith.subf %2, %9 : vector<8x32xf32>
    %11 = arith.mulf %10, %10 : vector<8x32xf32>
    %cst_7 = arith.constant dense<0.000000e+00> : vector<8xf32>
    %12 = vector.multi_reduction <add>, %11, %cst_7 [1] : vector<8x32xf32> to vector<8xf32>
    %13 = vector.shape_cast %12 : vector<8xf32> to vector<8x1xf32>
    %cst_8 = arith.constant 3.200000e+01 : f32
    %14 = vector.broadcast %cst_8 : f32 to vector<8x1xf32>
    %15 = arith.divf %13, %14 : vector<8x1xf32>
    %cst_9 = arith.constant 9.99999974E-6 : f32
    %16 = vector.broadcast %cst_9 : f32 to vector<8x1xf32>
    %17 = arith.addf %15, %16 : vector<8x1xf32>
    %18 = math.rsqrt %17 : vector<8x1xf32>
    %19 = vector.broadcast %18 : vector<8x1xf32> to vector<8x32xf32>
    %20 = arith.mulf %10, %19 : vector<8x32xf32>
    %21 = vector.broadcast %3 : vector<1x32xf32> to vector<8x32xf32>
    %22 = arith.mulf %20, %21 : vector<8x32xf32>
    %23 = vector.broadcast %4 : vector<1x32xf32> to vector<8x32xf32>
    %24 = arith.addf %22, %23 : vector<8x32xf32>
    %25 = arith.truncf %24 : vector<8x32xf32> to vector<8x32xbf16>
    %c0_10 = arith.constant 0 : index
    %c0_11 = arith.constant 0 : index
    %26 = vector.load %arg5[%c0_10, %c0_11] : memref<32x32xbf16, #tpu.memory_space<vmem>>, vector<32x32xbf16>
    %cst_12 = arith.constant dense<0.000000e+00> : vector<8x32xf32>
    %27 = tpu.matmul %25, %26, %cst_12 {dimension_numbers = #tpu.dot_dimension_numbers<[1], [0], [0], [1], [0, 0, 1, 1], [], []>} : vector<8x32xbf16>, vector<32x32xbf16>, vector<8x32xf32> -> vector<8x32xf32>
    %c0_13 = arith.constant 0 : index
    %c0_14 = arith.constant 0 : index
    %28 = vector.load %arg6[%c0_13, %c0_14] : memref<1x32xf32, #tpu.memory_space<vmem>>, vector<1x32xf32>
    %29 = vector.broadcast %28 : vector<1x32xf32> to vector<8x32xf32>
    %30 = arith.addf %27, %29 : vector<8x32xf32>
    %31 = arith.truncf %30 : vector<8x32xf32> to vector<8x32xbf16>
    %c0_15 = arith.constant 0 : index
    %c0_16 = arith.constant 0 : index
    %c0_17 = arith.constant 0 : index
    %32 = vector.load %arg2[%c0_15, %c0_16, %c0_17] : memref<1x8x32xbf16, #tpu.memory_space<vmem>>, vector<1x8x32xbf16>
    %33 = vector.shape_cast %32 : vector<1x8x32xbf16> to vector<8x32xbf16>
    %c0_18 = arith.constant 0 : index
    %c0_19 = arith.constant 0 : index
    %34 = vector.load %arg7[%c0_18, %c0_19] : memref<32x64xbf16, #tpu.memory_space<vmem>>, vector<32x64xbf16>
    %cst_20 = arith.constant dense<0.000000e+00> : vector<8x64xf32>
    %35 = tpu.matmul %33, %34, %cst_20 {dimension_numbers = #tpu.dot_dimension_numbers<[1], [0], [0], [1], [0, 0, 1, 1], [], []>} : vector<8x32xbf16>, vector<32x64xbf16>, vector<8x64xf32> -> vector<8x64xf32>
    %c0_21 = arith.constant 0 : index
    %c0_22 = arith.constant 0 : index
    %36 = vector.load %arg8[%c0_21, %c0_22] : memref<1x64xf32, #tpu.memory_space<vmem>>, vector<1x64xf32>
    %37 = vector.broadcast %36 : vector<1x64xf32> to vector<8x64xf32>
    %38 = arith.addf %35, %37 : vector<8x64xf32>
    %39 = arith.truncf %38 : vector<8x64xf32> to vector<8x64xbf16>
    %40 = vector.extract_strided_slice %39 {offsets = [0, 0], sizes = [8, 32], strides = [1, 1]} : vector<8x64xbf16> to vector<8x32xbf16>
    %41 = vector.extract_strided_slice %39 {offsets = [0, 32], sizes = [8, 32], strides = [1, 1]} : vector<8x64xbf16> to vector<8x32xbf16>
    %42 = vector.extract_strided_slice %31 {offsets = [0, 0], sizes = [8, 8], strides = [1, 1]} : vector<8x32xbf16> to vector<8x8xbf16>
    %43 = vector.extract_strided_slice %40 {offsets = [0, 0], sizes = [8, 8], strides = [1, 1]} : vector<8x32xbf16> to vector<8x8xbf16>
    %cst_23 = arith.constant dense<0.000000e+00> : vector<8x8xf32>
    %44 = tpu.matmul %42, %43, %cst_23 {dimension_numbers = #tpu.dot_dimension_numbers<[1], [1], [0], [0], [0, 0, 1, 0], [], []>} : vector<8x8xbf16>, vector<8x8xbf16>, vector<8x8xf32> -> vector<8x8xf32>
    %cst_24 = arith.constant 0.353553385 : f32
    %45 = vector.broadcast %cst_24 : f32 to vector<8x8xf32>
    %46 = arith.mulf %44, %45 : vector<8x8xf32>
    %cst_25 = arith.constant dense<0xFF800000> : vector<8xf32>
    %47 = vector.multi_reduction <maximumf>, %46, %cst_25 [1] : vector<8x8xf32> to vector<8xf32>
    %48 = vector.shape_cast %47 : vector<8xf32> to vector<8x1xf32>
    %49 = vector.broadcast %48 : vector<8x1xf32> to vector<8x8xf32>
    %50 = arith.subf %46, %49 : vector<8x8xf32>
    %51 = math.exp %50 : vector<8x8xf32>
    %cst_26 = arith.constant dense<0.000000e+00> : vector<8xf32>
    %52 = vector.multi_reduction <add>, %51, %cst_26 [1] : vector<8x8xf32> to vector<8xf32>
    %53 = vector.shape_cast %52 : vector<8xf32> to vector<8x1xf32>
    %54 = tpu.reciprocal %53 {approx = true} : vector<8x1xf32> -> vector<8x1xf32>
    %55 = vector.broadcast %54 : vector<8x1xf32> to vector<8x8xf32>
    %56 = arith.mulf %51, %55 : vector<8x8xf32>
    %57 = arith.truncf %56 : vector<8x8xf32> to vector<8x8xbf16>
    %58 = vector.extract_strided_slice %41 {offsets = [0, 0], sizes = [8, 8], strides = [1, 1]} : vector<8x32xbf16> to vector<8x8xbf16>
    %cst_27 = arith.constant dense<0.000000e+00> : vector<8x8xf32>
    %59 = tpu.matmul %57, %58, %cst_27 {dimension_numbers = #tpu.dot_dimension_numbers<[1], [0], [0], [1], [0, 0, 1, 1], [], []>} : vector<8x8xbf16>, vector<8x8xbf16>, vector<8x8xf32> -> vector<8x8xf32>
    %60 = vector.extract_strided_slice %31 {offsets = [0, 8], sizes = [8, 8], strides = [1, 1]} : vector<8x32xbf16> to vector<8x8xbf16>
    %61 = vector.extract_strided_slice %40 {offsets = [0, 8], sizes = [8, 8], strides = [1, 1]} : vector<8x32xbf16> to vector<8x8xbf16>
    %cst_28 = arith.constant dense<0.000000e+00> : vector<8x8xf32>
    %62 = tpu.matmul %60, %61, %cst_28 {dimension_numbers = #tpu.dot_dimension_numbers<[1], [1], [0], [0], [0, 0, 1, 0], [], []>} : vector<8x8xbf16>, vector<8x8xbf16>, vector<8x8xf32> -> vector<8x8xf32>
    %cst_29 = arith.constant 0.353553385 : f32
    %63 = vector.broadcast %cst_29 : f32 to vector<8x8xf32>
    %64 = arith.mulf %62, %63 : vector<8x8xf32>
    %cst_30 = arith.constant dense<0xFF800000> : vector<8xf32>
    %65 = vector.multi_reduction <maximumf>, %64, %cst_30 [1] : vector<8x8xf32> to vector<8xf32>
    %66 = vector.shape_cast %65 : vector<8xf32> to vector<8x1xf32>
    %67 = vector.broadcast %66 : vector<8x1xf32> to vector<8x8xf32>
    %68 = arith.subf %64, %67 : vector<8x8xf32>
    %69 = math.exp %68 : vector<8x8xf32>
    %cst_31 = arith.constant dense<0.000000e+00> : vector<8xf32>
    %70 = vector.multi_reduction <add>, %69, %cst_31 [1] : vector<8x8xf32> to vector<8xf32>
    %71 = vector.shape_cast %70 : vector<8xf32> to vector<8x1xf32>
    %72 = tpu.reciprocal %71 {approx = true} : vector<8x1xf32> -> vector<8x1xf32>
    %73 = vector.broadcast %72 : vector<8x1xf32> to vector<8x8xf32>
    %74 = arith.mulf %69, %73 : vector<8x8xf32>
    %75 = arith.truncf %74 : vector<8x8xf32> to vector<8x8xbf16>
    %76 = vector.extract_strided_slice %41 {offsets = [0, 8], sizes = [8, 8], strides = [1, 1]} : vector<8x32xbf16> to vector<8x8xbf16>
    %cst_32 = arith.constant dense<0.000000e+00> : vector<8x8xf32>
    %77 = tpu.matmul %75, %76, %cst_32 {dimension_numbers = #tpu.dot_dimension_numbers<[1], [0], [0], [1], [0, 0, 1, 1], [], []>} : vector<8x8xbf16>, vector<8x8xbf16>, vector<8x8xf32> -> vector<8x8xf32>
    %78 = vector.extract_strided_slice %31 {offsets = [0, 16], sizes = [8, 8], strides = [1, 1]} : vector<8x32xbf16> to vector<8x8xbf16>
    %79 = vector.extract_strided_slice %40 {offsets = [0, 16], sizes = [8, 8], strides = [1, 1]} : vector<8x32xbf16> to vector<8x8xbf16>
    %cst_33 = arith.constant dense<0.000000e+00> : vector<8x8xf32>
    %80 = tpu.matmul %78, %79, %cst_33 {dimension_numbers = #tpu.dot_dimension_numbers<[1], [1], [0], [0], [0, 0, 1, 0], [], []>} : vector<8x8xbf16>, vector<8x8xbf16>, vector<8x8xf32> -> vector<8x8xf32>
    %cst_34 = arith.constant 0.353553385 : f32
    %81 = vector.broadcast %cst_34 : f32 to vector<8x8xf32>
    %82 = arith.mulf %80, %81 : vector<8x8xf32>
    %cst_35 = arith.constant dense<0xFF800000> : vector<8xf32>
    %83 = vector.multi_reduction <maximumf>, %82, %cst_35 [1] : vector<8x8xf32> to vector<8xf32>
    %84 = vector.shape_cast %83 : vector<8xf32> to vector<8x1xf32>
    %85 = vector.broadcast %84 : vector<8x1xf32> to vector<8x8xf32>
    %86 = arith.subf %82, %85 : vector<8x8xf32>
    %87 = math.exp %86 : vector<8x8xf32>
    %cst_36 = arith.constant dense<0.000000e+00> : vector<8xf32>
    %88 = vector.multi_reduction <add>, %87, %cst_36 [1] : vector<8x8xf32> to vector<8xf32>
    %89 = vector.shape_cast %88 : vector<8xf32> to vector<8x1xf32>
    %90 = tpu.reciprocal %89 {approx = true} : vector<8x1xf32> -> vector<8x1xf32>
    %91 = vector.broadcast %90 : vector<8x1xf32> to vector<8x8xf32>
    %92 = arith.mulf %87, %91 : vector<8x8xf32>
    %93 = arith.truncf %92 : vector<8x8xf32> to vector<8x8xbf16>
    %94 = vector.extract_strided_slice %41 {offsets = [0, 16], sizes = [8, 8], strides = [1, 1]} : vector<8x32xbf16> to vector<8x8xbf16>
    %cst_37 = arith.constant dense<0.000000e+00> : vector<8x8xf32>
    %95 = tpu.matmul %93, %94, %cst_37 {dimension_numbers = #tpu.dot_dimension_numbers<[1], [0], [0], [1], [0, 0, 1, 1], [], []>} : vector<8x8xbf16>, vector<8x8xbf16>, vector<8x8xf32> -> vector<8x8xf32>
    %96 = vector.extract_strided_slice %31 {offsets = [0, 24], sizes = [8, 8], strides = [1, 1]} : vector<8x32xbf16> to vector<8x8xbf16>
    %97 = vector.extract_strided_slice %40 {offsets = [0, 24], sizes = [8, 8], strides = [1, 1]} : vector<8x32xbf16> to vector<8x8xbf16>
    %cst_38 = arith.constant dense<0.000000e+00> : vector<8x8xf32>
    %98 = tpu.matmul %96, %97, %cst_38 {dimension_numbers = #tpu.dot_dimension_numbers<[1], [1], [0], [0], [0, 0, 1, 0], [], []>} : vector<8x8xbf16>, vector<8x8xbf16>, vector<8x8xf32> -> vector<8x8xf32>
    %cst_39 = arith.constant 0.353553385 : f32
    %99 = vector.broadcast %cst_39 : f32 to vector<8x8xf32>
    %100 = arith.mulf %98, %99 : vector<8x8xf32>
    %cst_40 = arith.constant dense<0xFF800000> : vector<8xf32>
    %101 = vector.multi_reduction <maximumf>, %100, %cst_40 [1] : vector<8x8xf32> to vector<8xf32>
    %102 = vector.shape_cast %101 : vector<8xf32> to vector<8x1xf32>
    %103 = vector.broadcast %102 : vector<8x1xf32> to vector<8x8xf32>
    %104 = arith.subf %100, %103 : vector<8x8xf32>
    %105 = math.exp %104 : vector<8x8xf32>
    %cst_41 = arith.constant dense<0.000000e+00> : vector<8xf32>
    %106 = vector.multi_reduction <add>, %105, %cst_41 [1] : vector<8x8xf32> to vector<8xf32>
    %107 = vector.shape_cast %106 : vector<8xf32> to vector<8x1xf32>
    %108 = tpu.reciprocal %107 {approx = true} : vector<8x1xf32> -> vector<8x1xf32>
    %109 = vector.broadcast %108 : vector<8x1xf32> to vector<8x8xf32>
    %110 = arith.mulf %105, %109 : vector<8x8xf32>
    %111 = arith.truncf %110 : vector<8x8xf32> to vector<8x8xbf16>
    %112 = vector.extract_strided_slice %41 {offsets = [0, 24], sizes = [8, 8], strides = [1, 1]} : vector<8x32xbf16> to vector<8x8xbf16>
    %cst_42 = arith.constant dense<0.000000e+00> : vector<8x8xf32>
    %113 = tpu.matmul %111, %112, %cst_42 {dimension_numbers = #tpu.dot_dimension_numbers<[1], [0], [0], [1], [0, 0, 1, 1], [], []>} : vector<8x8xbf16>, vector<8x8xbf16>, vector<8x8xf32> -> vector<8x8xf32>
    %114 = tpu.concatenate %59, %77, %95, %113 in 1 : vector<8x8xf32>, vector<8x8xf32>, vector<8x8xf32>, vector<8x8xf32> -> vector<8x32xf32>
    %115 = arith.truncf %114 : vector<8x32xf32> to vector<8x32xbf16>
    %c0_43 = arith.constant 0 : index
    %c0_44 = arith.constant 0 : index
    %116 = vector.load %arg9[%c0_43, %c0_44] : memref<32x32xbf16, #tpu.memory_space<vmem>>, vector<32x32xbf16>
    %cst_45 = arith.constant dense<0.000000e+00> : vector<8x32xf32>
    %117 = tpu.matmul %115, %116, %cst_45 {dimension_numbers = #tpu.dot_dimension_numbers<[1], [0], [0], [1], [0, 0, 1, 1], [], []>} : vector<8x32xbf16>, vector<32x32xbf16>, vector<8x32xf32> -> vector<8x32xf32>
    %c0_46 = arith.constant 0 : index
    %c0_47 = arith.constant 0 : index
    %118 = vector.load %arg10[%c0_46, %c0_47] : memref<1x32xf32, #tpu.memory_space<vmem>>, vector<1x32xf32>
    %119 = vector.broadcast %118 : vector<1x32xf32> to vector<8x32xf32>
    %120 = arith.addf %117, %119 : vector<8x32xf32>
    %121 = arith.addf %2, %120 : vector<8x32xf32>
    %122 = arith.truncf %121 : vector<8x32xf32> to vector<8x32xbf16>
    %c0_48 = arith.constant 0 : index
    %c0_49 = arith.constant 0 : index
    %c0_50 = arith.constant 0 : index
    %123 = vector.load %arg11[%c0_48, %c0_49, %c0_50] : memref<1x8x32xbf16, #tpu.memory_space<vmem>>, vector<1x8x32xbf16>
    %124 = vector.shape_cast %123 : vector<1x8x32xbf16> to vector<8x32xbf16>
    %125 = vector.shape_cast %122 : vector<8x32xbf16> to vector<1x8x32xbf16>
    tpu.vector_store %arg11[%c0_48, %c0_49, %c0_50], %125 {strides = array<i32>} : memref<1x8x32xbf16, #tpu.memory_space<vmem>>, vector<1x8x32xbf16>,
    return
  }
  func.func @transform_0(%arg0: i32) -> (i32, i32, i32) {
    %c0_i32 = arith.constant 0 : i32
    %c0_i32_0 = arith.constant 0 : i32
    %c0_i32_1 = arith.constant 0 : i32
    return %arg0, %c0_i32, %c0_i32_0 : i32, i32, i32
  }
  func.func @transform_1(%arg0: i32) -> (i32, i32, i32) {
    %c0_i32 = arith.constant 0 : i32
    %c0_i32_0 = arith.constant 0 : i32
    %c0_i32_1 = arith.constant 0 : i32
    return %arg0, %c0_i32, %c0_i32_0 : i32, i32, i32
  }
  func.func @transform_2(%arg0: i32) -> (i32, i32) {
    %c0_i32 = arith.constant 0 : i32
    %c0_i32_0 = arith.constant 0 : i32
    %c0_i32_1 = arith.constant 0 : i32
    return %c0_i32, %c0_i32_0 : i32, i32
  }
  func.func @transform_3(%arg0: i32) -> (i32, i32) {
    %c0_i32 = arith.constant 0 : i32
    %c0_i32_0 = arith.constant 0 : i32
    %c0_i32_1 = arith.constant 0 : i32
    return %c0_i32, %c0_i32_0 : i32, i32
  }
  func.func @transform_4(%arg0: i32) -> (i32, i32) {
    %c0_i32 = arith.constant 0 : i32
    %c0_i32_0 = arith.constant 0 : i32
    %c0_i32_1 = arith.constant 0 : i32
    return %c0_i32, %c0_i32_0 : i32, i32
  }
  func.func @transform_5(%arg0: i32) -> (i32, i32) {
    %c0_i32 = arith.constant 0 : i32
    %c0_i32_0 = arith.constant 0 : i32
    %c0_i32_1 = arith.constant 0 : i32
    return %c0_i32, %c0_i32_0 : i32, i32
  }
  func.func @transform_6(%arg0: i32) -> (i32, i32) {
    %c0_i32 = arith.constant 0 : i32
    %c0_i32_0 = arith.constant 0 : i32
    %c0_i32_1 = arith.constant 0 : i32
    return %c0_i32, %c0_i32_0 : i32, i32
  }
  func.func @transform_7(%arg0: i32) -> (i32, i32) {
    %c0_i32 = arith.constant 0 : i32
    %c0_i32_0 = arith.constant 0 : i32
    %c0_i32_1 = arith.constant 0 : i32
    return %c0_i32, %c0_i32_0 : i32, i32
  }
  func.func @transform_8(%arg0: i32) -> (i32, i32) {
    %c0_i32 = arith.constant 0 : i32
    %c0_i32_0 = arith.constant 0 : i32
    %c0_i32_1 = arith.constant 0 : i32
    return %c0_i32, %c0_i32_0 : i32, i32
  }
  func.func @transform_9(%arg0: i32) -> (i32, i32) {
    %c0_i32 = arith.constant 0 : i32
    %c0_i32_0 = arith.constant 0 : i32
    %c0_i32_1 = arith.constant 0 : i32
    return %c0_i32, %c0_i32_0 : i32, i32
  }
  func.func @transform_10(%arg0: i32) -> (i32, i32, i32) {
    %c0_i32 = arith.constant 0 : i32
    %c0_i32_0 = arith.constant 0 : i32
    %c0_i32_1 = arith.constant 0 : i32
    return %arg0, %c0_i32, %c0_i32_0 : i32, i32, i32
  }
}

module attributes {stable_mosaic.version = 11 : i64} {
  func.func @kernel(%arg0: i32, %arg1: memref<1x8x32xbf16, #tpu.memory_space<vmem>>, %arg2: memref<1x32xf32, #tpu.memory_space<vmem>>, %arg3: memref<1x32xf32, #tpu.memory_space<vmem>>, %arg4: memref<32x96xbf16, #tpu.memory_space<vmem>>, %arg5: memref<1x96xf32, #tpu.memory_space<vmem>>, %arg6: memref<32x32xbf16, #tpu.memory_space<vmem>>, %arg7: memref<1x32xf32, #tpu.memory_space<vmem>>, %arg8: memref<1x8x32xbf16, #tpu.memory_space<vmem>>) attributes {dimension_semantics = [#tpu.dimension_semantics<parallel>], iteration_bounds = array<i64: 2>, scalar_prefetch = 0 : i64, scratch_operands = 0 : i64, tpu.core_type = #tpu.core_type<tc>, window_params = [{transform_indices = @transform_0, window_bounds = array<i64: 1, 8, 32>}, {pipeline_mode = #tpu.pipeline_mode<synchronous>, transform_indices = @transform_1, window_bounds = array<i64: 1, 32>}, {pipeline_mode = #tpu.pipeline_mode<synchronous>, transform_indices = @transform_2, window_bounds = array<i64: 1, 32>}, {pipeline_mode = #tpu.pipeline_mode<synchronous>, transform_indices = @transform_3, window_bounds = array<i64: 32, 96>}, {pipeline_mode = #tpu.pipeline_mode<synchronous>, transform_indices = @transform_4, window_bounds = array<i64: 1, 96>}, {pipeline_mode = #tpu.pipeline_mode<synchronous>, transform_indices = @transform_5, window_bounds = array<i64: 32, 32>}, {pipeline_mode = #tpu.pipeline_mode<synchronous>, transform_indices = @transform_6, window_bounds = array<i64: 1, 32>}, {transform_indices = @transform_7, window_bounds = array<i64: 1, 8, 32>}]} {
    %c0 = arith.constant 0 : index
    %c0_0 = arith.constant 0 : index
    %c0_1 = arith.constant 0 : index
    %0 = vector.load %arg1[%c0, %c0_0, %c0_1] : memref<1x8x32xbf16, #tpu.memory_space<vmem>>, vector<1x8x32xbf16>
    %1 = vector.shape_cast %0 : vector<1x8x32xbf16> to vector<8x32xbf16>
    %2 = arith.extf %1 : vector<8x32xbf16> to vector<8x32xf32>
    %c0_2 = arith.constant 0 : index
    %c0_3 = arith.constant 0 : index
    %3 = vector.load %arg2[%c0_2, %c0_3] : memref<1x32xf32, #tpu.memory_space<vmem>>, vector<1x32xf32>
    %c0_4 = arith.constant 0 : index
    %c0_5 = arith.constant 0 : index
    %4 = vector.load %arg3[%c0_4, %c0_5] : memref<1x32xf32, #tpu.memory_space<vmem>>, vector<1x32xf32>
    %cst = arith.constant dense<0.000000e+00> : vector<8xf32>
    %5 = vector.multi_reduction <add>, %2, %cst [1] : vector<8x32xf32> to vector<8xf32>
    %6 = vector.shape_cast %5 : vector<8xf32> to vector<8x1xf32>
    %cst_6 = arith.constant 3.200000e+01 : f32
    %7 = vector.broadcast %cst_6 : f32 to vector<8x1xf32>
    %8 = arith.divf %6, %7 : vector<8x1xf32>
    %9 = vector.broadcast %8 : vector<8x1xf32> to vector<8x32xf32>
    %10 = arith.subf %2, %9 : vector<8x32xf32>
    %11 = arith.mulf %10, %10 : vector<8x32xf32>
    %cst_7 = arith.constant dense<0.000000e+00> : vector<8xf32>
    %12 = vector.multi_reduction <add>, %11, %cst_7 [1] : vector<8x32xf32> to vector<8xf32>
    %13 = vector.shape_cast %12 : vector<8xf32> to vector<8x1xf32>
    %cst_8 = arith.constant 3.200000e+01 : f32
    %14 = vector.broadcast %cst_8 : f32 to vector<8x1xf32>
    %15 = arith.divf %13, %14 : vector<8x1xf32>
    %cst_9 = arith.constant 9.99999974E-6 : f32
    %16 = vector.broadcast %cst_9 : f32 to vector<8x1xf32>
    %17 = arith.addf %15, %16 : vector<8x1xf32>
    %18 = math.rsqrt %17 : vector<8x1xf32>
    %19 = vector.broadcast %18 : vector<8x1xf32> to vector<8x32xf32>
    %20 = arith.mulf %10, %19 : vector<8x32xf32>
    %21 = vector.broadcast %3 : vector<1x32xf32> to vector<8x32xf32>
    %22 = arith.mulf %20, %21 : vector<8x32xf32>
    %23 = vector.broadcast %4 : vector<1x32xf32> to vector<8x32xf32>
    %24 = arith.addf %22, %23 : vector<8x32xf32>
    %25 = arith.truncf %24 : vector<8x32xf32> to vector<8x32xbf16>
    %c0_10 = arith.constant 0 : index
    %c0_11 = arith.constant 0 : index
    %26 = vector.load %arg4[%c0_10, %c0_11] : memref<32x96xbf16, #tpu.memory_space<vmem>>, vector<32x96xbf16>
    %cst_12 = arith.constant dense<0.000000e+00> : vector<8x96xf32>
    %27 = tpu.matmul %25, %26, %cst_12 {dimension_numbers = #tpu.dot_dimension_numbers<[1], [0], [0], [1], [0, 0, 1, 1], [], []>} : vector<8x32xbf16>, vector<32x96xbf16>, vector<8x96xf32> -> vector<8x96xf32>
    %c0_13 = arith.constant 0 : index
    %c0_14 = arith.constant 0 : index
    %28 = vector.load %arg5[%c0_13, %c0_14] : memref<1x96xf32, #tpu.memory_space<vmem>>, vector<1x96xf32>
    %29 = vector.broadcast %28 : vector<1x96xf32> to vector<8x96xf32>
    %30 = arith.addf %27, %29 : vector<8x96xf32>
    %31 = arith.truncf %30 : vector<8x96xf32> to vector<8x96xbf16>
    %32 = vector.extract_strided_slice %31 {offsets = [0, 0], sizes = [8, 32], strides = [1, 1]} : vector<8x96xbf16> to vector<8x32xbf16>
    %33 = vector.extract_strided_slice %31 {offsets = [0, 32], sizes = [8, 32], strides = [1, 1]} : vector<8x96xbf16> to vector<8x32xbf16>
    %34 = vector.extract_strided_slice %31 {offsets = [0, 64], sizes = [8, 32], strides = [1, 1]} : vector<8x96xbf16> to vector<8x32xbf16>
    %35 = tpu.iota {dimensions = array<i32: 0>} : vector<8x8xi32>
    %36 = tpu.iota {dimensions = array<i32: 1>} : vector<8x8xi32>
    %37 = arith.cmpi sgt, %36, %35 : vector<8x8xi32>
    %cst_15 = arith.constant -1.000000e+30 : f32
    %cst_16 = arith.constant 0.000000e+00 : f32
    %38 = vector.broadcast %cst_15 : f32 to vector<8x8xf32>
    %39 = vector.broadcast %cst_16 : f32 to vector<8x8xf32>
    %40 = arith.select %37, %38, %39 : vector<8x8xi1>, vector<8x8xf32>
    %41 = vector.extract_strided_slice %32 {offsets = [0, 0], sizes = [8, 8], strides = [1, 1]} : vector<8x32xbf16> to vector<8x8xbf16>
    %42 = vector.extract_strided_slice %33 {offsets = [0, 0], sizes = [8, 8], strides = [1, 1]} : vector<8x32xbf16> to vector<8x8xbf16>
    %cst_17 = arith.constant dense<0.000000e+00> : vector<8x8xf32>
    %43 = tpu.matmul %41, %42, %cst_17 {dimension_numbers = #tpu.dot_dimension_numbers<[1], [1], [0], [0], [0, 0, 1, 0], [], []>} : vector<8x8xbf16>, vector<8x8xbf16>, vector<8x8xf32> -> vector<8x8xf32>
    %cst_18 = arith.constant 0.353553385 : f32
    %44 = vector.broadcast %cst_18 : f32 to vector<8x8xf32>
    %45 = arith.mulf %43, %44 : vector<8x8xf32>
    %46 = arith.addf %45, %40 : vector<8x8xf32>
    %cst_19 = arith.constant dense<0xFF800000> : vector<8xf32>
    %47 = vector.multi_reduction <maximumf>, %46, %cst_19 [1] : vector<8x8xf32> to vector<8xf32>
    %48 = vector.shape_cast %47 : vector<8xf32> to vector<8x1xf32>
    %49 = vector.broadcast %48 : vector<8x1xf32> to vector<8x8xf32>
    %50 = arith.subf %46, %49 : vector<8x8xf32>
    %51 = math.exp %50 : vector<8x8xf32>
    %cst_20 = arith.constant dense<0.000000e+00> : vector<8xf32>
    %52 = vector.multi_reduction <add>, %51, %cst_20 [1] : vector<8x8xf32> to vector<8xf32>
    %53 = vector.shape_cast %52 : vector<8xf32> to vector<8x1xf32>
    %54 = tpu.reciprocal %53 {approx = true} : vector<8x1xf32> -> vector<8x1xf32>
    %55 = vector.broadcast %54 : vector<8x1xf32> to vector<8x8xf32>
    %56 = arith.mulf %51, %55 : vector<8x8xf32>
    %57 = arith.truncf %56 : vector<8x8xf32> to vector<8x8xbf16>
    %58 = vector.extract_strided_slice %34 {offsets = [0, 0], sizes = [8, 8], strides = [1, 1]} : vector<8x32xbf16> to vector<8x8xbf16>
    %cst_21 = arith.constant dense<0.000000e+00> : vector<8x8xf32>
    %59 = tpu.matmul %57, %58, %cst_21 {dimension_numbers = #tpu.dot_dimension_numbers<[1], [0], [0], [1], [0, 0, 1, 1], [], []>} : vector<8x8xbf16>, vector<8x8xbf16>, vector<8x8xf32> -> vector<8x8xf32>
    %60 = vector.extract_strided_slice %32 {offsets = [0, 8], sizes = [8, 8], strides = [1, 1]} : vector<8x32xbf16> to vector<8x8xbf16>
    %61 = vector.extract_strided_slice %33 {offsets = [0, 8], sizes = [8, 8], strides = [1, 1]} : vector<8x32xbf16> to vector<8x8xbf16>
    %cst_22 = arith.constant dense<0.000000e+00> : vector<8x8xf32>
    %62 = tpu.matmul %60, %61, %cst_22 {dimension_numbers = #tpu.dot_dimension_numbers<[1], [1], [0], [0], [0, 0, 1, 0], [], []>} : vector<8x8xbf16>, vector<8x8xbf16>, vector<8x8xf32> -> vector<8x8xf32>
    %cst_23 = arith.constant 0.353553385 : f32
    %63 = vector.broadcast %cst_23 : f32 to vector<8x8xf32>
    %64 = arith.mulf %62, %63 : vector<8x8xf32>
    %65 = arith.addf %64, %40 : vector<8x8xf32>
    %cst_24 = arith.constant dense<0xFF800000> : vector<8xf32>
    %66 = vector.multi_reduction <maximumf>, %65, %cst_24 [1] : vector<8x8xf32> to vector<8xf32>
    %67 = vector.shape_cast %66 : vector<8xf32> to vector<8x1xf32>
    %68 = vector.broadcast %67 : vector<8x1xf32> to vector<8x8xf32>
    %69 = arith.subf %65, %68 : vector<8x8xf32>
    %70 = math.exp %69 : vector<8x8xf32>
    %cst_25 = arith.constant dense<0.000000e+00> : vector<8xf32>
    %71 = vector.multi_reduction <add>, %70, %cst_25 [1] : vector<8x8xf32> to vector<8xf32>
    %72 = vector.shape_cast %71 : vector<8xf32> to vector<8x1xf32>
    %73 = tpu.reciprocal %72 {approx = true} : vector<8x1xf32> -> vector<8x1xf32>
    %74 = vector.broadcast %73 : vector<8x1xf32> to vector<8x8xf32>
    %75 = arith.mulf %70, %74 : vector<8x8xf32>
    %76 = arith.truncf %75 : vector<8x8xf32> to vector<8x8xbf16>
    %77 = vector.extract_strided_slice %34 {offsets = [0, 8], sizes = [8, 8], strides = [1, 1]} : vector<8x32xbf16> to vector<8x8xbf16>
    %cst_26 = arith.constant dense<0.000000e+00> : vector<8x8xf32>
    %78 = tpu.matmul %76, %77, %cst_26 {dimension_numbers = #tpu.dot_dimension_numbers<[1], [0], [0], [1], [0, 0, 1, 1], [], []>} : vector<8x8xbf16>, vector<8x8xbf16>, vector<8x8xf32> -> vector<8x8xf32>
    %79 = vector.extract_strided_slice %32 {offsets = [0, 16], sizes = [8, 8], strides = [1, 1]} : vector<8x32xbf16> to vector<8x8xbf16>
    %80 = vector.extract_strided_slice %33 {offsets = [0, 16], sizes = [8, 8], strides = [1, 1]} : vector<8x32xbf16> to vector<8x8xbf16>
    %cst_27 = arith.constant dense<0.000000e+00> : vector<8x8xf32>
    %81 = tpu.matmul %79, %80, %cst_27 {dimension_numbers = #tpu.dot_dimension_numbers<[1], [1], [0], [0], [0, 0, 1, 0], [], []>} : vector<8x8xbf16>, vector<8x8xbf16>, vector<8x8xf32> -> vector<8x8xf32>
    %cst_28 = arith.constant 0.353553385 : f32
    %82 = vector.broadcast %cst_28 : f32 to vector<8x8xf32>
    %83 = arith.mulf %81, %82 : vector<8x8xf32>
    %84 = arith.addf %83, %40 : vector<8x8xf32>
    %cst_29 = arith.constant dense<0xFF800000> : vector<8xf32>
    %85 = vector.multi_reduction <maximumf>, %84, %cst_29 [1] : vector<8x8xf32> to vector<8xf32>
    %86 = vector.shape_cast %85 : vector<8xf32> to vector<8x1xf32>
    %87 = vector.broadcast %86 : vector<8x1xf32> to vector<8x8xf32>
    %88 = arith.subf %84, %87 : vector<8x8xf32>
    %89 = math.exp %88 : vector<8x8xf32>
    %cst_30 = arith.constant dense<0.000000e+00> : vector<8xf32>
    %90 = vector.multi_reduction <add>, %89, %cst_30 [1] : vector<8x8xf32> to vector<8xf32>
    %91 = vector.shape_cast %90 : vector<8xf32> to vector<8x1xf32>
    %92 = tpu.reciprocal %91 {approx = true} : vector<8x1xf32> -> vector<8x1xf32>
    %93 = vector.broadcast %92 : vector<8x1xf32> to vector<8x8xf32>
    %94 = arith.mulf %89, %93 : vector<8x8xf32>
    %95 = arith.truncf %94 : vector<8x8xf32> to vector<8x8xbf16>
    %96 = vector.extract_strided_slice %34 {offsets = [0, 16], sizes = [8, 8], strides = [1, 1]} : vector<8x32xbf16> to vector<8x8xbf16>
    %cst_31 = arith.constant dense<0.000000e+00> : vector<8x8xf32>
    %97 = tpu.matmul %95, %96, %cst_31 {dimension_numbers = #tpu.dot_dimension_numbers<[1], [0], [0], [1], [0, 0, 1, 1], [], []>} : vector<8x8xbf16>, vector<8x8xbf16>, vector<8x8xf32> -> vector<8x8xf32>
    %98 = vector.extract_strided_slice %32 {offsets = [0, 24], sizes = [8, 8], strides = [1, 1]} : vector<8x32xbf16> to vector<8x8xbf16>
    %99 = vector.extract_strided_slice %33 {offsets = [0, 24], sizes = [8, 8], strides = [1, 1]} : vector<8x32xbf16> to vector<8x8xbf16>
    %cst_32 = arith.constant dense<0.000000e+00> : vector<8x8xf32>
    %100 = tpu.matmul %98, %99, %cst_32 {dimension_numbers = #tpu.dot_dimension_numbers<[1], [1], [0], [0], [0, 0, 1, 0], [], []>} : vector<8x8xbf16>, vector<8x8xbf16>, vector<8x8xf32> -> vector<8x8xf32>
    %cst_33 = arith.constant 0.353553385 : f32
    %101 = vector.broadcast %cst_33 : f32 to vector<8x8xf32>
    %102 = arith.mulf %100, %101 : vector<8x8xf32>
    %103 = arith.addf %102, %40 : vector<8x8xf32>
    %cst_34 = arith.constant dense<0xFF800000> : vector<8xf32>
    %104 = vector.multi_reduction <maximumf>, %103, %cst_34 [1] : vector<8x8xf32> to vector<8xf32>
    %105 = vector.shape_cast %104 : vector<8xf32> to vector<8x1xf32>
    %106 = vector.broadcast %105 : vector<8x1xf32> to vector<8x8xf32>
    %107 = arith.subf %103, %106 : vector<8x8xf32>
    %108 = math.exp %107 : vector<8x8xf32>
    %cst_35 = arith.constant dense<0.000000e+00> : vector<8xf32>
    %109 = vector.multi_reduction <add>, %108, %cst_35 [1] : vector<8x8xf32> to vector<8xf32>
    %110 = vector.shape_cast %109 : vector<8xf32> to vector<8x1xf32>
    %111 = tpu.reciprocal %110 {approx = true} : vector<8x1xf32> -> vector<8x1xf32>
    %112 = vector.broadcast %111 : vector<8x1xf32> to vector<8x8xf32>
    %113 = arith.mulf %108, %112 : vector<8x8xf32>
    %114 = arith.truncf %113 : vector<8x8xf32> to vector<8x8xbf16>
    %115 = vector.extract_strided_slice %34 {offsets = [0, 24], sizes = [8, 8], strides = [1, 1]} : vector<8x32xbf16> to vector<8x8xbf16>
    %cst_36 = arith.constant dense<0.000000e+00> : vector<8x8xf32>
    %116 = tpu.matmul %114, %115, %cst_36 {dimension_numbers = #tpu.dot_dimension_numbers<[1], [0], [0], [1], [0, 0, 1, 1], [], []>} : vector<8x8xbf16>, vector<8x8xbf16>, vector<8x8xf32> -> vector<8x8xf32>
    %117 = tpu.concatenate %59, %78, %97, %116 in 1 : vector<8x8xf32>, vector<8x8xf32>, vector<8x8xf32>, vector<8x8xf32> -> vector<8x32xf32>
    %118 = arith.truncf %117 : vector<8x32xf32> to vector<8x32xbf16>
    %c0_37 = arith.constant 0 : index
    %c0_38 = arith.constant 0 : index
    %119 = vector.load %arg6[%c0_37, %c0_38] : memref<32x32xbf16, #tpu.memory_space<vmem>>, vector<32x32xbf16>
    %cst_39 = arith.constant dense<0.000000e+00> : vector<8x32xf32>
    %120 = tpu.matmul %118, %119, %cst_39 {dimension_numbers = #tpu.dot_dimension_numbers<[1], [0], [0], [1], [0, 0, 1, 1], [], []>} : vector<8x32xbf16>, vector<32x32xbf16>, vector<8x32xf32> -> vector<8x32xf32>
    %c0_40 = arith.constant 0 : index
    %c0_41 = arith.constant 0 : index
    %121 = vector.load %arg7[%c0_40, %c0_41] : memref<1x32xf32, #tpu.memory_space<vmem>>, vector<1x32xf32>
    %122 = vector.broadcast %121 : vector<1x32xf32> to vector<8x32xf32>
    %123 = arith.addf %120, %122 : vector<8x32xf32>
    %124 = arith.addf %2, %123 : vector<8x32xf32>
    %125 = arith.truncf %124 : vector<8x32xf32> to vector<8x32xbf16>
    %c0_42 = arith.constant 0 : index
    %c0_43 = arith.constant 0 : index
    %c0_44 = arith.constant 0 : index
    %126 = vector.load %arg8[%c0_42, %c0_43, %c0_44] : memref<1x8x32xbf16, #tpu.memory_space<vmem>>, vector<1x8x32xbf16>
    %127 = vector.shape_cast %126 : vector<1x8x32xbf16> to vector<8x32xbf16>
    %128 = vector.shape_cast %125 : vector<8x32xbf16> to vector<1x8x32xbf16>
    tpu.vector_store %arg8[%c0_42, %c0_43, %c0_44], %128 {strides = array<i32>} : memref<1x8x32xbf16, #tpu.memory_space<vmem>>, vector<1x8x32xbf16>,
    return
  }
  func.func @transform_0(%arg0: i32) -> (i32, i32, i32) {
    %c0_i32 = arith.constant 0 : i32
    %c0_i32_0 = arith.constant 0 : i32
    %c0_i32_1 = arith.constant 0 : i32
    return %arg0, %c0_i32, %c0_i32_0 : i32, i32, i32
  }
  func.func @transform_1(%arg0: i32) -> (i32, i32) {
    %c0_i32 = arith.constant 0 : i32
    %c0_i32_0 = arith.constant 0 : i32
    %c0_i32_1 = arith.constant 0 : i32
    return %c0_i32, %c0_i32_0 : i32, i32
  }
  func.func @transform_2(%arg0: i32) -> (i32, i32) {
    %c0_i32 = arith.constant 0 : i32
    %c0_i32_0 = arith.constant 0 : i32
    %c0_i32_1 = arith.constant 0 : i32
    return %c0_i32, %c0_i32_0 : i32, i32
  }
  func.func @transform_3(%arg0: i32) -> (i32, i32) {
    %c0_i32 = arith.constant 0 : i32
    %c0_i32_0 = arith.constant 0 : i32
    %c0_i32_1 = arith.constant 0 : i32
    return %c0_i32, %c0_i32_0 : i32, i32
  }
  func.func @transform_4(%arg0: i32) -> (i32, i32) {
    %c0_i32 = arith.constant 0 : i32
    %c0_i32_0 = arith.constant 0 : i32
    %c0_i32_1 = arith.constant 0 : i32
    return %c0_i32, %c0_i32_0 : i32, i32
  }
  func.func @transform_5(%arg0: i32) -> (i32, i32) {
    %c0_i32 = arith.constant 0 : i32
    %c0_i32_0 = arith.constant 0 : i32
    %c0_i32_1 = arith.constant 0 : i32
    return %c0_i32, %c0_i32_0 : i32, i32
  }
  func.func @transform_6(%arg0: i32) -> (i32, i32) {
    %c0_i32 = arith.constant 0 : i32
    %c0_i32_0 = arith.constant 0 : i32
    %c0_i32_1 = arith.constant 0 : i32
    return %c0_i32, %c0_i32_0 : i32, i32
  }
  func.func @transform_7(%arg0: i32) -> (i32, i32, i32) {
    %c0_i32 = arith.constant 0 : i32
    %c0_i32_0 = arith.constant 0 : i32
    %c0_i32_1 = arith.constant 0 : i32
    return %arg0, %c0_i32, %c0_i32_0 : i32, i32, i32
  }
}

module attributes {stable_mosaic.version = 11 : i64} {
  func.func @kernel(%arg0: i32, %arg1: i32, %arg2: memref<16x32xbf16, #tpu.memory_space<vmem>>, %arg3: memref<1x32xf32, #tpu.memory_space<vmem>>, %arg4: memref<1x32xf32, #tpu.memory_space<vmem>>, %arg5: memref<64x32xbf16, #tpu.memory_space<vmem>>, %arg6: memref<16x64xf32, #tpu.memory_space<vmem>>) attributes {dimension_semantics = [#tpu.dimension_semantics<parallel>, #tpu.dimension_semantics<parallel>], iteration_bounds = array<i64: 1, 1>, scalar_prefetch = 0 : i64, scratch_operands = 0 : i64, tpu.core_type = #tpu.core_type<tc>, window_params = [{transform_indices = @transform_0, window_bounds = array<i64: 16, 32>}, {pipeline_mode = #tpu.pipeline_mode<synchronous>, transform_indices = @transform_1, window_bounds = array<i64: 1, 32>}, {pipeline_mode = #tpu.pipeline_mode<synchronous>, transform_indices = @transform_2, window_bounds = array<i64: 1, 32>}, {transform_indices = @transform_3, window_bounds = array<i64: 64, 32>}, {transform_indices = @transform_4, window_bounds = array<i64: 16, 64>}]} {
    %c0 = arith.constant 0 : index
    %c0_0 = arith.constant 0 : index
    %0 = vector.load %arg2[%c0, %c0_0] : memref<16x32xbf16, #tpu.memory_space<vmem>>, vector<16x32xbf16>
    %1 = arith.extf %0 : vector<16x32xbf16> to vector<16x32xf32>
    %c0_1 = arith.constant 0 : index
    %c0_2 = arith.constant 0 : index
    %2 = vector.load %arg3[%c0_1, %c0_2] : memref<1x32xf32, #tpu.memory_space<vmem>>, vector<1x32xf32>
    %c0_3 = arith.constant 0 : index
    %c0_4 = arith.constant 0 : index
    %3 = vector.load %arg4[%c0_3, %c0_4] : memref<1x32xf32, #tpu.memory_space<vmem>>, vector<1x32xf32>
    %cst = arith.constant dense<0.000000e+00> : vector<16xf32>
    %4 = vector.multi_reduction <add>, %1, %cst [1] : vector<16x32xf32> to vector<16xf32>
    %5 = vector.shape_cast %4 : vector<16xf32> to vector<16x1xf32>
    %cst_5 = arith.constant 3.200000e+01 : f32
    %6 = vector.broadcast %cst_5 : f32 to vector<16x1xf32>
    %7 = arith.divf %5, %6 : vector<16x1xf32>
    %8 = vector.broadcast %7 : vector<16x1xf32> to vector<16x32xf32>
    %9 = arith.subf %1, %8 : vector<16x32xf32>
    %10 = arith.mulf %9, %9 : vector<16x32xf32>
    %cst_6 = arith.constant dense<0.000000e+00> : vector<16xf32>
    %11 = vector.multi_reduction <add>, %10, %cst_6 [1] : vector<16x32xf32> to vector<16xf32>
    %12 = vector.shape_cast %11 : vector<16xf32> to vector<16x1xf32>
    %cst_7 = arith.constant 3.200000e+01 : f32
    %13 = vector.broadcast %cst_7 : f32 to vector<16x1xf32>
    %14 = arith.divf %12, %13 : vector<16x1xf32>
    %cst_8 = arith.constant 9.99999974E-6 : f32
    %15 = vector.broadcast %cst_8 : f32 to vector<16x1xf32>
    %16 = arith.addf %14, %15 : vector<16x1xf32>
    %17 = math.rsqrt %16 : vector<16x1xf32>
    %18 = vector.broadcast %17 : vector<16x1xf32> to vector<16x32xf32>
    %19 = arith.mulf %9, %18 : vector<16x32xf32>
    %20 = vector.broadcast %2 : vector<1x32xf32> to vector<16x32xf32>
    %21 = arith.mulf %19, %20 : vector<16x32xf32>
    %22 = vector.broadcast %3 : vector<1x32xf32> to vector<16x32xf32>
    %23 = arith.addf %21, %22 : vector<16x32xf32>
    %24 = arith.truncf %23 : vector<16x32xf32> to vector<16x32xbf16>
    %c0_9 = arith.constant 0 : index
    %c0_10 = arith.constant 0 : index
    %25 = vector.load %arg5[%c0_9, %c0_10] : memref<64x32xbf16, #tpu.memory_space<vmem>>, vector<64x32xbf16>
    %cst_11 = arith.constant dense<0.000000e+00> : vector<16x64xf32>
    %26 = tpu.matmul %24, %25, %cst_11 {dimension_numbers = #tpu.dot_dimension_numbers<[1], [1], [0], [0], [0, 0, 1, 0], [], []>} : vector<16x32xbf16>, vector<64x32xbf16>, vector<16x64xf32> -> vector<16x64xf32>
    %c0_12 = arith.constant 0 : index
    %c0_13 = arith.constant 0 : index
    %27 = vector.load %arg6[%c0_12, %c0_13] : memref<16x64xf32, #tpu.memory_space<vmem>>, vector<16x64xf32>
    tpu.vector_store %arg6[%c0_12, %c0_13], %26 {strides = array<i32>} : memref<16x64xf32, #tpu.memory_space<vmem>>, vector<16x64xf32>,
    return
  }
  func.func @transform_0(%arg0: i32, %arg1: i32) -> (i32, i32) {
    %c0_i32 = arith.constant 0 : i32
    %c0_i32_0 = arith.constant 0 : i32
    return %arg0, %c0_i32 : i32, i32
  }
  func.func @transform_1(%arg0: i32, %arg1: i32) -> (i32, i32) {
    %c0_i32 = arith.constant 0 : i32
    %c0_i32_0 = arith.constant 0 : i32
    %c0_i32_1 = arith.constant 0 : i32
    return %c0_i32, %c0_i32_0 : i32, i32
  }
  func.func @transform_2(%arg0: i32, %arg1: i32) -> (i32, i32) {
    %c0_i32 = arith.constant 0 : i32
    %c0_i32_0 = arith.constant 0 : i32
    %c0_i32_1 = arith.constant 0 : i32
    return %c0_i32, %c0_i32_0 : i32, i32
  }
  func.func @transform_3(%arg0: i32, %arg1: i32) -> (i32, i32) {
    %c0_i32 = arith.constant 0 : i32
    %c0_i32_0 = arith.constant 0 : i32
    return %arg1, %c0_i32 : i32, i32
  }
  func.func @transform_4(%arg0: i32, %arg1: i32) -> (i32, i32) {
    %c0_i32 = arith.constant 0 : i32
    return %arg0, %arg1 : i32, i32
  }
}

</mosaic_0001>

<bundles_post_ra>
// kernel: token_decoder_forward.7
= control target key start
LH: loop header
LB: loop body
LE: loop exit
PB: predicated region body
PF: predicated region fallthrough
CT: control target
= control target key end

     0   :  { %s858_s24 = smov 0   ;;  %s953_s0 = inlined_call_operand.vmem [shape: bf16[2,8,32], index: 0, kind: input, shape index: {}]   ;;  %s954_s1 = inlined_call_operand.vmem [shape: f32[1,32], index: 1, kind: input, shape index: {}]   ;;  %s955_s2 = inlined_call_operand.vmem [shape: f32[1,32], index: 2, kind: input, shape index: {}]   ;;  %s956_s3 = inlined_call_operand.vmem [shape: bf16[32,96], index: 3, kind: input, shape index: {}]   ;;  %s957_s4 = inlined_call_operand.vmem [shape: f32[1,96], index: 4, kind: input, shape index: {}]   ;;  %s958_s5 = inlined_call_operand.vmem [shape: bf16[32,32], index: 5, kind: input, shape index: {}]   ;;  %s959_s6 = inlined_call_operand.vmem [shape: f32[1,32], index: 6, kind: input, shape index: {}]   ;;  %s960_s7 = inlined_call_operand.vmem [shape: bf16[2,8,32], index: 7, kind: output, shape index: {}]  }
   0x1 LB: > { %s707_s25 = sadd.s32 4294967295, %s800_s24   ;;  %p711_p0 = scmp.ge.s32.totalorder %s800_s24, 1  ;;  %s800_s24 = sphi %s858_s24, %s17_s24  }
   0x2   : > { %p236_p1 = scmp.lt.s32.totalorder %s800_s24, 3 }
   0x4   : > { %p237_p2 = pnand %p711_p0, %p236_p1 }
   0x5   : > { %p266_p3 = scmp.lt.s32.totalorder (!%p237_p2), %s707_s25, 1  ;;  %s803_s17 = smov (!%p237_p2), 104  }
   0x6   : > { %240 = sbr.rel (%p237_p2) target bundleno = 1347 (0x543), region = 48  ;;  %s804_s18 = smov (!%p237_p2), 120  }
   0x7   : > { %s805_s19 = smov (!%p237_p2), 96   ;;  %s806_s20 = smov (!%p237_p2), 72  }
   0x8   : > { %s807_s21 = smov (!%p237_p2), 88   ;;  %s808_s22 = smov (!%p237_p2), 112  }
   0x9   : > { %s809_s23 = smov (!%p237_p2), 80   ;;  %s811_s27 = smov (!%p237_p2), 64  }
   0xa   : > { %s812_s28 = smov (!%p237_p2), 56   ;;  %s814_s30 = smov (!%p237_p2), 48  }
   0xb   : > { %s962_s25 = smov (!%p266_p3, %s707_s25), 1  ;;  %vm279_vm0 = vcmask 261120   ;;  %v802_v3 = vmov 32.0   ;;  %v743_v15 = vld [vmem:[%s956_s3 + $0x8] sm:$0xff]  ;;  %v742_v16 = vld [vmem:[%s956_s3] sm:$0xff]  ;;  %vm366_vm5 = vcmask 64512   ;;  %v355_v51 = vlaneseq }
   0xc   : > { %s712_s26 = sshll.u32 %s962_s25, 2  ;;  %774 = vrcp.f32 %v802_v3  ;;  %347 = vmatpush.bf16.msra.mxu0 %v743_v15  ;;  %v770_v26 = vld [vmem:[%s954_s1] ss:$0 sm:$0xff]  ;;  %v810_v55 = vmov 0.0   ;;  %vm405_vm7 = vcmask 1043456   ;;  %s815_s8 = smov 8  }
   0xd   : > { %s269_s29 = scalar_lea.vmem %s953_s0, %s712_s26  ;;  %v771_v29 = vld [vmem:[%s955_s2] ss:$0 sm:$0xff]  ;;  %v356_v52 = vshrl.u32 %v355_v51, 7  ;;  %v358_v53 = vand.u32 127, %v355_v51  ;;  %s816_s9 = smov 24   ;;  %vm609_vm8 = vcmask 130048  }
   0xe   : > { %v275_v0 = vld [vmem:[%s269_s29] sm:$0xf]  ;;  %s813_s29 = smov 40   ;;  %s817_s10 = smov 16   ;;  %vm611_vm9 = vcmask 195584   ;;  %vm652_vm10 = vcmask 257024  }
   0xf   : > { %v874_v1 = vunpack.c.l.bf16 %v275_v0  ;;  %v772_v33 = vld [vmem:[%s957_s4] ss:$0 sm:$0xff]  ;;  %vm359_vm6 = vcmp.gt.s32.totalorder %v358_v53, %v356_v52 }
  0x10   : > { %348 = vmatpush.bf16.msra.mxu0 %v742_v16  ;;  %v360_v56 = vsel %vm359_vm6, -1e+30, %v810_v55 }
  0x11   : > { %v280_v2 = vsel %vm279_vm0, %v874_v1, 0.0 }
  0x12   : > { %281 = vadd.xlane.f32.xlu0 %v280_v2  ;;  %v775_v4 = vpop.eup %774 }
  0x13   : > { %v284_v5 = vmul.f32 32.0, %v775_v4  ;;  %vm288_vm1 = vweird.f32 %v775_v4 }
  0x15   : > { %v285_v6 = vsub.f32 1.0, %v284_v5 }
  0x17   : > { %v286_v7 = vmul.f32 %v775_v4, %v285_v6 }
  0x19   : > { %v287_v8 = vadd.f32 %v775_v4, %v286_v7 }
  0x1b   : > { %v289_v9 = vsel %vm288_vm1, %v775_v4, %v287_v8 }
  0x85   : > { %v282_v10 = vpop.xlane.xlu0 %281 }
  0x86   : > { %v290_v11 = vmul.f32 %v289_v9, %v282_v10 }
  0x88   : > { %v291_v12 = vsub.f32 %v874_v1, %v290_v11 }
  0x8a   : > { %v292_v13 = vmul.f32 %v291_v12, %v291_v12 }
  0x8c   : > { %v293_v14 = vsel %vm279_vm0, %v292_v13, 0.0 }
  0x8d   : > { %294 = vadd.xlane.f32.xlu0 %v293_v14 }
 0x100   : > { %v295_v17 = vpop.xlane.xlu0 %294 }
 0x101   : > { %v296_v18 = vmul.f32 %v295_v17, %v289_v9 }
 0x103   : > { %v297_v19 = vadd.f32 1e-05, %v296_v18 }
 0x105   : > { %776 = vrsqrt.f32 %v297_v19  ;;  %vm304_vm3 = vweird.f32 %v297_v19 }
 0x10b   : > { %v777_v20 = vpop.eup %776 }
 0x10c   : > { %v299_v21 = vmul.f32 %v777_v20, %v297_v19  ;;  %vm305_vm2 = vweird.f32 %v777_v20 }
 0x10d   : > { %vm306_vm4 = vmor %vm304_vm3, %vm305_vm2 }
 0x10e   : > { %v300_v22 = vmul.f32 %v777_v20, %v299_v21 }
 0x110   : > { %v301_v23 = vmul.f32 0.5, %v300_v22 }
 0x112   : > { %v302_v24 = vsub.f32 1.5, %v301_v23 }
 0x114   : > { %v303_v25 = vmul.f32 %v777_v20, %v302_v24 }
 0x116   : > { %v307_v27 = vsel %vm306_vm4, %v777_v20, %v303_v25 }
 0x117   : > { %v308_v28 = vmul.f32 %v307_v27, %v291_v12 }
 0x119   : > { %v312_v30 = vmul.f32 %v770_v26, %v308_v28 }
 0x11b   : > { %v316_v31 = vadd.f32 %v771_v29, %v312_v30 }
 0x11d   : > { %v317_v32 = vpack.c.bf16 %v316_v31, %v316_v31 }
 0x11f   : > { %722 = vmatmul.msk.bf16.vlgmr.msra.gmra.mxu0 %vm279_vm0, %v317_v32 }
 0x19c   : > { %v350_v34 = vpop.f32.mrf.mxu0 }
 0x19d   : > { %v351_v35 = vadd.f32 %v772_v33, %v350_v34 }
 0x19f   : > { %v354_v36 = vpack.c.bf16 %v351_v35, %v351_v35 }
 0x1a1   : > { %v362_v37 = vunpack.c.l.b16 %v354_v36 }
 0x1a3   : > { %v896_v38 = vpack.c.b16 %v362_v37, %v362_v37 }
 0x1a4   : > { %v352_v39 = vpop.f32.mrf.mxu0 }
 0x1a5   : > { %538 = vrot.lane.b32.xlu0 %v896_v38, %s803_s17  ;;  %422 = vrot.lane.b32.xlu2 %v896_v38, %s804_s18 }
 0x1a6   : > { %364 = vrot.lane.b32.xlu1 %v896_v38, %s805_s19  ;;  %s273_s19 = scalar_lea.vmem %s960_s7, %s712_s26 }
 0x1ad   : > { %540 = vrot.lane.b32.xlu2 %v896_v38, %s806_s20 }
 0x1ae   : > { %424 = vrot.lane.b32.xlu1 %v896_v38, %s807_s21 }
 0x1b5   : > { %480 = vrot.lane.b32.xlu2 %v896_v38, %s808_s22 }
 0x1b6   : > { %482 = vrot.lane.b32.xlu1 %v896_v38, %s809_s23 }
 0x1ff   : > { %v423_v40 = vpop.permute.xlu2 %422 }
 0x207   : > { %v541_v43 = vpop.permute.xlu2 %540 }
 0x208   : > { %v546_v46 = vsel %vm366_vm5, %v541_v43, 0 }
 0x20f   : > { %v481_v49 = vpop.permute.xlu2 %480 }
 0x217   : > { %v539_v50 = vpop.permute.xlu0 %538 }
 0x218   : > { %v365_v41 = vpop.permute.xlu1 %364 }
 0x219   : > { %v371_v42 = vsel %vm366_vm5, %v365_v41, 0 }
 0x21a   : > { %380 = vmatpush.bf16.xpose.msra.mxu1 %v371_v42 }
 0x220   : > { %v425_v44 = vpop.permute.xlu1 %424 }
 0x221   : > { %723 = vmatmul.msk.bf16.vlgmr.msra.gmra.mxu1 %vm366_vm5, %v354_v36  ;;  %v430_v45 = vsel %vm366_vm5, %v425_v44, 0 }
 0x222   : > { %439 = vmatpush.bf16.xpose.msra.mxu3 %v430_v45 }
 0x228   : > { %v483_v47 = vpop.permute.xlu1 %482 }
 0x229   : > { %725 = vmatmul.msk.bf16.vlgmr.msra.gmra.mxu3 %vm366_vm5, %v423_v40  ;;  %v488_v48 = vsel %vm366_vm5, %v483_v47, 0 }
 0x22a   : > { %555 = vmatpush.bf16.xpose.msrb.mxu3 %v546_v46  ;;  %497 = vmatpush.bf16.xpose.msrb.mxu0 %v488_v48 }
 0x231   : > { %727 = vmatmul.msk.bf16.vlgmr.msrb.gmra.mxu0 %vm366_vm5, %v481_v49 }
 0x239   : > { %729 = vmatmul.msk.bf16.vlgmr.msrb.gmra.mxu3 %vm366_vm5, %v539_v50 }
 0x29e   : > { %v382_v54 = vpop.f32.mrf.mxu1 }
 0x29f   : > { %v386_v57 = vmul.f32 0.35355338, %v382_v54 }
 0x2a1   : > { %v387_v58 = vadd.f32 %v386_v57, %v360_v56 }
 0x2a3   : > { %v388_v59 = vsel %vm366_vm5, %v387_v58, -inf }
 0x2a4   : > { %389 = vmax.xlane.f32.xlu1 %v388_v59 }
 0x2a6   : > { %v384_v60 = vpop.f32.mrf.mxu1 }
 0x2ac   : > { %v441_v61 = vpop.f32.mrf.mxu3 }
 0x2ad   : > { %v445_v62 = vmul.f32 0.35355338, %v441_v61 }
 0x2ae   : > { %v499_v63 = vpop.f32.mrf.mxu0 }
 0x2af   : > { %v446_v0 = vadd.f32 %v445_v62, %v360_v56  ;;  %v503_v2 = vmul.f32 0.35355338, %v499_v63 }
 0x2b1   : > { %v447_v3 = vsel %vm366_vm5, %v446_v0, -inf  ;;  %v504_v5 = vadd.f32 %v503_v2, %v360_v56  ;;  %v745_v2 = vld [vmem:[%s958_s5 + $0x8] sm:$0xff] }
 0x2b2   : > { %448 = vmax.xlane.f32.xlu2 %v447_v3  ;;  %643 = vmatpush.bf16.msra.mxu0 %v745_v2  ;;  %v744_v3 = vld [vmem:[%s958_s5] sm:$0xff] }
 0x2b3   : > { %v505_v7 = vsel %vm366_vm5, %v504_v5, -inf }
 0x2b4   : > { %v443_v4 = vpop.f32.mrf.mxu3 }
 0x2b6   : > { %v501_v6 = vpop.f32.mrf.mxu0  ;;  %644 = vmatpush.bf16.msra.mxu0 %v744_v3 }
 0x2ba   : > { %506 = vmax.xlane.f32.xlu2 %v505_v7 }
 0x2bc   : > { %v557_v8 = vpop.f32.mrf.mxu3 }
 0x2bd   : > { %v561_v9 = vmul.f32 0.35355338, %v557_v8 }
 0x2bf   : > { %v562_v10 = vadd.f32 %v561_v9, %v360_v56 }
 0x2c1   : > { %v563_v11 = vsel %vm366_vm5, %v562_v10, -inf }
 0x2c2   : > { %564 = vmax.xlane.f32.xlu0 %v563_v11  ;;  %v773_v11 = vld [vmem:[%s959_s6] ss:$0 sm:$0xff] }
 0x2c4   : > { %v559_v12 = vpop.f32.mrf.mxu3 }
 0x2d2   : > { %400 = vrot.lane.b32.xlu2 %v896_v38, %s811_s27 }
 0x2d6   : > { %459 = vrot.lane.b32.xlu0 %v896_v38, %s812_s28 }
 0x2da   : > { %575 = vrot.lane.b32.xlu2 %v896_v38, %s813_s29 }
 0x2de   : > { %517 = vrot.lane.b32.xlu0 %v896_v38, %s814_s30 }
 0x317   : > { %v390_v13 = vpop.xlane.xlu1 %389 }
 0x318   : > { %v391_v14 = vsub.f32 %v387_v58, %v390_v13 }
 0x31a   : > { %v392_v15 = vmul.f32 1.442695, %v391_v14 }
 0x31c   : > { %778 = vpow2.f32 %v392_v15 }
 0x322   : > { %v779_v16 = vpop.eup %778 }
 0x323   : > { %v394_v17 = vsel %vm366_vm5, %v779_v16, 0.0 }
 0x324   : > { %395 = vadd.xlane.f32.xlu1 %v394_v17 }
 0x325   : > { %v449_v18 = vpop.xlane.xlu2 %448 }
 0x326   : > { %v450_v19 = vsub.f32 %v446_v0, %v449_v18 }
 0x328   : > { %v451_v20 = vmul.f32 1.442695, %v450_v19 }
 0x32a   : > { %780 = vpow2.f32 %v451_v20 }
 0x32d   : > { %v507_v21 = vpop.xlane.xlu2 %506 }
 0x32e   : > { %v508_v28 = vsub.f32 %v504_v5, %v507_v21 }
 0x330   : > { %v781_v22 = vpop.eup %780  ;;  %v509_v30 = vmul.f32 1.442695, %v508_v28 }
 0x331   : > { %v453_v23 = vsel %vm366_vm5, %v781_v22, 0.0 }
 0x332   : > { %454 = vadd.xlane.f32.xlu1 %v453_v23 }
 0x335   : > { %v565_v24 = vpop.xlane.xlu0 %564  ;;  %v401_v25 = vpop.permute.xlu2 %400 }
 0x336   : > { %v566_v26 = vsub.f32 %v562_v10, %v565_v24  ;;  %v407_v27 = vsel %vm405_vm7, %v401_v25, 0 }
 0x337   : > { %416 = vmatpush.bf16.msra.mxu2 %v407_v27 }
 0x338   : > { %v567_v29 = vmul.f32 1.442695, %v566_v26 }
 0x33a   : > { %782 = vpow2.f32 %v567_v29 }
 0x33b   : > { %784 = vpow2.f32 %v509_v30 }
 0x33d   : > { %v576_v42 = vpop.permute.xlu2 %575 }
 0x33e   : > { %v581_v44 = vsel %vm405_vm7, %v576_v42, 0 }
 0x340   : > { %v783_v31 = vpop.eup %782 }
 0x341   : > { %v569_v32 = vsel %vm366_vm5, %v783_v31, 0.0  ;;  %v785_v33 = vpop.eup %784 }
 0x342   : > { %570 = vadd.xlane.f32.xlu1 %v569_v32  ;;  %v511_v36 = vsel %vm366_vm5, %v785_v33, 0.0 }
 0x348   : > { %v460_v34 = vpop.permute.xlu0 %459 }
 0x349   : > { %v465_v35 = vsel %vm405_vm7, %v460_v34, 0 }
 0x34a   : > { %474 = vmatpush.bf16.msrb.mxu2 %v465_v35  ;;  %512 = vadd.xlane.f32.xlu1 %v511_v36 }
 0x350   : > { %v518_v37 = vpop.permute.xlu0 %517 }
 0x351   : > { %v523_v38 = vsel %vm405_vm7, %v518_v37, 0 }
 0x352   : > { %532 = vmatpush.bf16.msrb.mxu1 %v523_v38 }
 0x397   : > { %v396_v39 = vpop.xlane.xlu1 %395 }
 0x398   : > { %786 = vrcp.f32 %v396_v39 }
 0x39e   : > { %v787_v40 = vpop.eup %786 }
 0x39f   : > { %v398_v41 = vmul.f32 %v787_v40, %v779_v16 }
 0x3a1   : > { %v399_v43 = vpack.c.bf16 %v398_v41, %v398_v41 }
 0x3a3   : > { %724 = vmatmul.msk.bf16.vlgmr.msra.gmra.mxu2 %vm366_vm5, %v399_v43 }
 0x3a4   : > { %590 = vmatpush.bf16.msra.mxu2 %v581_v44 }
 0x3a5   : > { %v455_v45 = vpop.xlane.xlu1 %454 }
 0x3a6   : > { %788 = vrcp.f32 %v455_v45 }
 0x3ac   : > { %v789_v46 = vpop.eup %788 }
 0x3ad   : > { %v457_v47 = vmul.f32 %v789_v46, %v781_v22 }
 0x3af   : > { %v458_v48 = vpack.c.bf16 %v457_v47, %v457_v47 }
 0x3b3   : > { %726 = vmatmul.msk.bf16.vlgmr.msrb.gmra.mxu2 %vm366_vm5, %v458_v48 }
 0x3b5   : > { %v571_v49 = vpop.xlane.xlu1 %570 }
 0x3b6   : > { %790 = vrcp.f32 %v571_v49 }
 0x3bc   : > { %v791_v50 = vpop.eup %790 }
 0x3bd   : > { %v573_v51 = vmul.f32 %v791_v50, %v783_v31  ;;  %v513_v52 = vpop.xlane.xlu1 %512 }
 0x3be   : > { %792 = vrcp.f32 %v513_v52 }
 0x3bf   : > { %v574_v53 = vpack.c.bf16 %v573_v51, %v573_v51 }
 0x3c3   : > { %730 = vmatmul.msk.bf16.vlgmr.msra.gmra.mxu2 %vm366_vm5, %v574_v53 }
 0x3c4   : > { %v793_v54 = vpop.eup %792 }
 0x3c5   : > { %v515_v55 = vmul.f32 %v793_v54, %v785_v33 }
 0x3c7   : > { %v516_v56 = vpack.c.bf16 %v515_v55, %v515_v55 }
 0x3c9   : > { %728 = vmatmul.msk.bf16.vlgmr.msrb.gmra.mxu1 %vm366_vm5, %v516_v56 }
 0x426   : > { %v418_v57 = vpop.f32.mrf.mxu2 }
 0x42e   : > { %v420_v58 = vpop.f32.mrf.mxu2 }
 0x436   : > { %v476_v59 = vpop.f32.mrf.mxu2 }
 0x437   : > { %597 = vrot.lane.b32.xlu1 %v476_v59, %s815_s8 }
 0x43e   : > { %v478_v60 = vpop.f32.mrf.mxu2 }
 0x446   : > { %v534_v61 = vpop.f32.mrf.mxu1  ;;  %v592_v62 = vpop.f32.mrf.mxu2 }
 0x447   : > { %605 = vrot.lane.b32.xlu0 %v592_v62, %s816_s9  ;;  %601 = vrot.lane.b32.xlu2 %v534_v61, %s817_s10 }
 0x44e   : > { %v536_v63 = vpop.f32.mrf.mxu1  ;;  %v594_v0 = vpop.f32.mrf.mxu2 }
 0x4a1   : > { %v602_v6 = vpop.permute.xlu2 %601 }
 0x4a9   : > { %v598_v4 = vpop.permute.xlu1 %597 }
 0x4aa   : > { %v608_v5 = vsel %vm366_vm5, %v418_v57, %v598_v4 }
 0x4ab   : > { %v610_v8 = vsel %vm609_vm8, %v608_v5, %v602_v6 }
 0x4b9   : > { %v606_v7 = vpop.permute.xlu0 %605 }
 0x4ba   : > { %v612_v9 = vsel %vm611_vm9, %v610_v8, %v606_v7 }
 0x4bb   : > { %v613_v10 = vpack.c.bf16 %v612_v9, %v612_v9 }
 0x4bd   : > { %739 = vmatmul.msk.bf16.vlgmr.msra.gmra.mxu0 %vm279_vm0, %v613_v10 }
 0x53a   : > { %v646_v12 = vpop.f32.mrf.mxu0 }
 0x53b   : > { %v647_v13 = vadd.f32 %v773_v11, %v646_v12 }
 0x53d   : > { %v650_v14 = vadd.f32 %v647_v13, %v874_v1 }
 0x53f   : > { %v651_v15 = vpack.c.bf16 %v650_v14, %v650_v14 }
 0x541   : > { %653 = vst.msk [vmem:[%s273_s19] sm:$0xf] %vm652_vm10, %v651_v15 }
 0x542   : > { %v648_v16 = vpop.f32.mrf.mxu0 }
 0x543 PF: > { %s17_s24 = sadd.s32 1, %s800_s24  }
 0x544   : > { %p14_p4 = scmp.ge.s32.totalorder %s17_s24, 4  }
 0x546   :  { %16 = sbr.rel (!%p14_p4) target bundleno = 1 (0x1), region = 78 }

// kernel: token_decoder_forward.13
= control target key start
LH: loop header
LB: loop body
LE: loop exit
PB: predicated region body
PF: predicated region fallthrough
CT: control target
= control target key end

     0   :  { %vm25_vm0 = vcmask 261120   ;;  %s291_s0 = inlined_call_operand.vmem [shape: bf16[16,32], index: 0, kind: input, shape index: {}]   ;;  %s292_s1 = inlined_call_operand.vmem [shape: f32[1,32], index: 1, kind: input, shape index: {}]   ;;  %s293_s2 = inlined_call_operand.vmem [shape: f32[1,32], index: 2, kind: input, shape index: {}]   ;;  %s294_s3 = inlined_call_operand.vmem [shape: bf16[64,32], index: 3, kind: input, shape index: {}]   ;;  %s295_s4 = inlined_call_operand.hbm [shape: f32[16,64], index: 4, kind: output, shape index: {}]  }
   0x1   :  { %v188_v0 = vld [vmem:[%s291_s0] sm:$0xff]  }
   0x2   :  { %v189_v1 = vunpack.c.l.bf16 %v188_v0 }
   0x3   :  { %9 = vsyncpa [#allocation3], 0  ;;  %v190_v3 = vunpack.c.h.bf16 %v188_v0  ;;  %v229_v5 = vmov 32.0   ;;  %v186_v22 = vld [vmem:[%s294_s3 + $0x18] sm:$0xff]  ;;  %v185_v24 = vld [vmem:[%s294_s3 + $0x10] sm:$0xff]  ;;  %vm145_vm8 = vcmask 523264  }
   0x4   :  { %v26_v2 = vsel %vm25_vm0, %v189_v1, 0.0  ;;  %197 = vrcp.f32 %v229_v5  ;;  %v129_v23 = vsel %vm25_vm0, %v186_v22, 0  ;;  %v126_v25 = vsel %vm25_vm0, %v185_v24, 0  ;;  %v184_v26 = vld [vmem:[%s294_s3 + $0x8] sm:$0xff]  ;;  %v183_v28 = vld [vmem:[%s294_s3] sm:$0xff]  ;;  %s154_s30 = sshll.u32 %s295_s4, 4  ;;  %s155_s30 = int_to_ptr.hbm [resolvable:$true] %s154_s30 }
   0x5   :  { %27 = vadd.xlane.f32.xlu0 %v26_v2  ;;  %v29_v4 = vsel %vm25_vm0, %v190_v3, 0.0  ;;  %135 = vmatpush.bf16.xpose.msra.mxu0 %v129_v23  ;;  %v123_v27 = vsel %vm25_vm0, %v184_v26, 0  ;;  %v120_v29 = vsel %vm25_vm0, %v183_v28, 0  ;;  %v195_v49 = vld [vmem:[%s292_s1] ss:$0 sm:$0xff]  ;;  %s230_s1 = smov [#allocation2]  }
   0x6   :  { %v196_v54 = vld [vmem:[%s293_s2] ss:$0 sm:$0xff]  ;;  %s152_s27 = sshll.u32 %s230_s1, 4  ;;  %s231_s2 = smov 128   ;;  %s153_s27 = int_to_ptr.vmem [resolvable:$true] %s152_s27 }
   0x7   :  { %s232_s5 = smov 8  }
   0xa   :  { %v198_v6 = vpop.eup %197 }
   0xb   :  { %v33_v7 = vmul.f32 32.0, %v198_v6  ;;  %vm37_vm1 = vweird.f32 %v198_v6 }
   0xd   :  { %30 = vadd.xlane.f32.xlu0 %v29_v4  ;;  %v34_v8 = vsub.f32 1.0, %v33_v7  ;;  %136 = vmatpush.bf16.xpose.msra.mxu0 %v126_v25 }
   0xf   :  { %v35_v9 = vmul.f32 %v198_v6, %v34_v8 }
  0x11   :  { %v36_v10 = vadd.f32 %v198_v6, %v35_v9 }
  0x13   :  { %v38_v11 = vsel %vm37_vm1, %v198_v6, %v36_v10 }
  0x15   :  { %137 = vmatpush.bf16.xpose.msra.mxu0 %v123_v27 }
  0x1d   :  { %138 = vmatpush.bf16.xpose.msra.mxu0 %v120_v29 }
  0x78   :  { %v28_v12 = vpop.xlane.xlu0 %27 }
  0x79   :  { %v39_v13 = vmul.f32 %v38_v11, %v28_v12 }
  0x7b   :  { %v41_v14 = vsub.f32 %v189_v1, %v39_v13 }
  0x7d   :  { %v43_v15 = vmul.f32 %v41_v14, %v41_v14 }
  0x7f   :  { %v45_v16 = vsel %vm25_vm0, %v43_v15, 0.0 }
  0x80   :  { %46 = vadd.xlane.f32.xlu1 %v45_v16  ;;  %v31_v17 = vpop.xlane.xlu0 %30 }
  0x81   :  { %v40_v18 = vmul.f32 %v38_v11, %v31_v17 }
  0x83   :  { %v42_v19 = vsub.f32 %v190_v3, %v40_v18 }
  0x85   :  { %v44_v20 = vmul.f32 %v42_v19, %v42_v19 }
  0x87   :  { %v48_v21 = vsel %vm25_vm0, %v44_v20, 0.0 }
  0x88   :  { %49 = vadd.xlane.f32.xlu1 %v48_v21 }
  0xf3   :  { %v47_v30 = vpop.xlane.xlu1 %46 }
  0xf4   :  { %v51_v31 = vmul.f32 %v47_v30, %v38_v11 }
  0xf6   :  { %v53_v32 = vadd.f32 1e-05, %v51_v31 }
  0xf8   :  { %199 = vrsqrt.f32 %v53_v32  ;;  %vm61_vm3 = vweird.f32 %v53_v32 }
  0xfb   :  { %v50_v33 = vpop.xlane.xlu1 %49 }
  0xfc   :  { %v52_v34 = vmul.f32 %v50_v33, %v38_v11 }
  0xfe   :  { %v200_v35 = vpop.eup %199  ;;  %v54_v36 = vadd.f32 1e-05, %v52_v34 }
  0xff   :  { %v56_v37 = vmul.f32 %v200_v35, %v53_v32  ;;  %vm62_vm2 = vweird.f32 %v200_v35 }
 0x100   :  { %201 = vrsqrt.f32 %v54_v36  ;;  %vm63_vm4 = vmor %vm61_vm3, %vm62_vm2  ;;  %vm71_vm6 = vweird.f32 %v54_v36 }
 0x101   :  { %v57_v38 = vmul.f32 %v200_v35, %v56_v37 }
 0x103   :  { %v58_v39 = vmul.f32 0.5, %v57_v38 }
 0x105   :  { %v59_v40 = vsub.f32 1.5, %v58_v39 }
 0x106   :  { %v202_v41 = vpop.eup %201 }
 0x107   :  { %v60_v42 = vmul.f32 %v200_v35, %v59_v40  ;;  %v66_v43 = vmul.f32 %v202_v41, %v54_v36  ;;  %vm72_vm5 = vweird.f32 %v202_v41 }
 0x108   :  { %vm73_vm7 = vmor %vm71_vm6, %vm72_vm5 }
 0x109   :  { %v67_v44 = vmul.f32 %v202_v41, %v66_v43  ;;  %v64_v45 = vsel %vm63_vm4, %v200_v35, %v60_v42 }
 0x10a   :  { %v75_v48 = vmul.f32 %v64_v45, %v41_v14 }
 0x10b   :  { %v68_v46 = vmul.f32 0.5, %v67_v44 }
 0x10c   :  { %v80_v53 = vmul.f32 %v195_v49, %v75_v48 }
 0x10d   :  { %v69_v47 = vsub.f32 1.5, %v68_v46 }
 0x10e   :  { %v85_v56 = vadd.f32 %v196_v54, %v80_v53 }
 0x10f   :  { %v70_v50 = vmul.f32 %v202_v41, %v69_v47 }
 0x111   :  { %v74_v51 = vsel %vm73_vm7, %v202_v41, %v70_v50 }
 0x112   :  { %v76_v52 = vmul.f32 %v74_v51, %v42_v19 }
 0x114   :  { %v81_v55 = vmul.f32 %v195_v49, %v76_v52 }
 0x116   :  { %v86_v57 = vadd.f32 %v196_v54, %v81_v55 }
 0x118   :  { %v87_v58 = vpack.c.bf16 %v86_v57, %v85_v56 }
 0x11a   :  { %182 = vmatmul.msk.bf16.vlgmr.msra.gmra.mxu0 %vm25_vm0, %v87_v58 }
 0x197   :  { %v140_v59 = vpop.f32.mrf.mxu0 }
 0x198   :  { %146 = vst.msk [vmem:[#allocation2] sm:$0xff] %vm145_vm8, %v140_v59 }
 0x19f   :  { %v142_v60 = vpop.f32.mrf.mxu0 }
 0x1a0   :  { %147 = vst.msk [vmem:[#allocation2 + $0x8] sm:$0xff] %vm145_vm8, %v142_v60 }
 0x1a1   :  { %160 = dma.vmem_to_hbm [thread:$0]  %s153_s27, 256, %s155_s30, [#allocation3], %s231_s2, %s231_s2, %s232_s5  }
 0x1a2   :  { %227 = dma.done.wait [#allocation3], 256  }
 0x1a3   :  { %228 = vsyncadd [#allocation3], 4294967040 }
 0x1a4   :  { %165 = vsyncpa [#allocation3], 1 }

// kernel: token_decoder_forward.9
= control target key start
LH: loop header
LB: loop body
LE: loop exit
PB: predicated region body
PF: predicated region fallthrough
CT: control target
= control target key end

     0   :  { %vm33_vm0 = vcmask 261120   ;;  %v295_v5 = vmov 32.0   ;;  %vm222_vm8 = vcmask 257024   ;;  %s402_s0 = inlined_call_operand.vmem [shape: bf16[16,32], index: 0, kind: input, shape index: {}]   ;;  %s403_s1 = inlined_call_operand.vmem [shape: f32[1,32], index: 1, kind: input, shape index: {}]   ;;  %s404_s2 = inlined_call_operand.vmem [shape: f32[1,32], index: 2, kind: input, shape index: {}]   ;;  %s405_s4 = inlined_call_operand.vmem [shape: f32[1,128], index: 4, kind: input, shape index: {}]   ;;  %s406_s3 = inlined_call_operand.vmem [shape: bf16[32,128], index: 3, kind: input, shape index: {}]   ;;  %s407_s5 = inlined_call_operand.vmem [shape: bf16[128,32], index: 5, kind: input, shape index: {}]   ;;  %s408_s6 = inlined_call_operand.vmem [shape: f32[1,32], index: 6, kind: input, shape index: {}]   ;;  %s409_s7 = inlined_call_operand.vmem [shape: bf16[16,32], index: 7, kind: output, shape index: {}]  }
   0x1   :  { %v281_v0 = vld [vmem:[%s402_s0] sm:$0xff]   ;;  %289 = vrcp.f32 %v295_v5  ;;  %v271_v22 = vld [vmem:[%s406_s3 + $0x8] sm:$0xff]  ;;  %v279_v27 = vld [vmem:[%s407_s5 + $0x38] sm:$0xff] }
   0x2   :  { %v339_v1 = vunpack.c.l.bf16 %v281_v0  ;;  %v343_v3 = vunpack.c.h.bf16 %v281_v0  ;;  %125 = vmatpush.bf16.msra.mxu0 %v271_v22  ;;  %v270_v24 = vld [vmem:[%s406_s3] sm:$0xff]  ;;  %204 = vmatpush.bf16.msra.mxu1 %v279_v27  ;;  %v278_v30 = vld [vmem:[%s407_s5 + $0x30] sm:$0xff]  ;;  %v277_v34 = vld [vmem:[%s407_s5 + $0x28] sm:$0xff] }
   0x3   :  { %v276_v37 = vld [vmem:[%s407_s5 + $0x20] sm:$0xff]  ;;  %v275_v57 = vld [vmem:[%s407_s5 + $0x18] sm:$0xff]  ;;  %v274_v58 = vld [vmem:[%s407_s5 + $0x10] sm:$0xff] }
   0x4   :  { %v34_v2 = vsel %vm33_vm0, %v339_v1, 0.0  ;;  %v37_v4 = vsel %vm33_vm0, %v343_v3, 0.0  ;;  %v285_v47 = vld [vmem:[%s403_s1] ss:$0 sm:$0xff]  ;;  %v273_v59 = vld [vmem:[%s407_s5 + $0x8] sm:$0xff] }
   0x5   :  { %35 = vadd.xlane.f32.xlu0 %v34_v2  ;;  %v286_v52 = vld [vmem:[%s404_s2] ss:$0 sm:$0xff] }
   0x6   :  { %126 = vmatpush.bf16.msra.mxu0 %v270_v24  ;;  %205 = vmatpush.bf16.msra.mxu1 %v278_v30  ;;  %v272_v60 = vld [vmem:[%s407_s5] sm:$0xff] }
   0x7   :  { %v290_v6 = vpop.eup %289  ;;  %v287_v62 = vld [vmem:[%s405_s4] ss:$0 sm:$0xff] }
   0x8   :  { %v41_v7 = vmul.f32 32.0, %v290_v6  ;;  %vm45_vm1 = vweird.f32 %v290_v6 }
   0xa   :  { %v42_v8 = vsub.f32 1.0, %v41_v7  ;;  %206 = vmatpush.bf16.msra.mxu1 %v277_v34  ;;  %v288_v7 = vld [vmem:[%s408_s6] ss:$0 sm:$0xff] }
   0xc   :  { %v43_v9 = vmul.f32 %v290_v6, %v42_v8 }
   0xd   :  { %38 = vadd.xlane.f32.xlu0 %v37_v4 }
   0xe   :  { %v44_v10 = vadd.f32 %v290_v6, %v43_v9  ;;  %207 = vmatpush.bf16.msra.mxu1 %v276_v37 }
  0x10   :  { %v46_v11 = vsel %vm45_vm1, %v290_v6, %v44_v10 }
  0x12   :  { %208 = vmatpush.bf16.msra.mxu1 %v275_v57 }
  0x16   :  { %209 = vmatpush.bf16.msra.mxu1 %v274_v58 }
  0x1a   :  { %210 = vmatpush.bf16.msra.mxu1 %v273_v59 }
  0x1e   :  { %211 = vmatpush.bf16.msra.mxu1 %v272_v60 }
  0x78   :  { %v36_v12 = vpop.xlane.xlu0 %35 }
  0x79   :  { %v47_v13 = vmul.f32 %v46_v11, %v36_v12 }
  0x7b   :  { %v49_v14 = vsub.f32 %v339_v1, %v47_v13 }
  0x7d   :  { %v51_v15 = vmul.f32 %v49_v14, %v49_v14 }
  0x7f   :  { %v53_v16 = vsel %vm33_vm0, %v51_v15, 0.0 }
  0x80   :  { %54 = vadd.xlane.f32.xlu1 %v53_v16  ;;  %v39_v17 = vpop.xlane.xlu0 %38 }
  0x81   :  { %v48_v18 = vmul.f32 %v46_v11, %v39_v17 }
  0x83   :  { %v50_v19 = vsub.f32 %v343_v3, %v48_v18 }
  0x85   :  { %v52_v20 = vmul.f32 %v50_v19, %v50_v19 }
  0x87   :  { %v56_v21 = vsel %vm33_vm0, %v52_v20, 0.0 }
  0x88   :  { %57 = vadd.xlane.f32.xlu1 %v56_v21 }
  0xf3   :  { %v55_v23 = vpop.xlane.xlu1 %54 }
  0xf4   :  { %v59_v25 = vmul.f32 %v55_v23, %v46_v11 }
  0xf6   :  { %v61_v26 = vadd.f32 1e-05, %v59_v25 }
  0xf8   :  { %291 = vrsqrt.f32 %v61_v26  ;;  %vm69_vm3 = vweird.f32 %v61_v26 }
  0xfb   :  { %v58_v28 = vpop.xlane.xlu1 %57 }
  0xfc   :  { %v60_v29 = vmul.f32 %v58_v28, %v46_v11 }
  0xfe   :  { %v292_v31 = vpop.eup %291  ;;  %v62_v32 = vadd.f32 1e-05, %v60_v29 }
  0xff   :  { %v64_v33 = vmul.f32 %v292_v31, %v61_v26  ;;  %vm70_vm2 = vweird.f32 %v292_v31 }
 0x100   :  { %293 = vrsqrt.f32 %v62_v32  ;;  %vm71_vm4 = vmor %vm69_vm3, %vm70_vm2  ;;  %vm79_vm6 = vweird.f32 %v62_v32 }
 0x101   :  { %v65_v35 = vmul.f32 %v292_v31, %v64_v33 }
 0x103   :  { %v66_v36 = vmul.f32 0.5, %v65_v35 }
 0x105   :  { %v67_v38 = vsub.f32 1.5, %v66_v36 }
 0x106   :  { %v294_v39 = vpop.eup %293 }
 0x107   :  { %v68_v40 = vmul.f32 %v292_v31, %v67_v38  ;;  %v74_v41 = vmul.f32 %v294_v39, %v62_v32  ;;  %vm80_vm5 = vweird.f32 %v294_v39 }
 0x108   :  { %vm81_vm7 = vmor %vm79_vm6, %vm80_vm5 }
 0x109   :  { %v75_v42 = vmul.f32 %v294_v39, %v74_v41  ;;  %v72_v43 = vsel %vm71_vm4, %v292_v31, %v68_v40 }
 0x10a   :  { %v83_v46 = vmul.f32 %v72_v43, %v49_v14 }
 0x10b   :  { %v76_v44 = vmul.f32 0.5, %v75_v42 }
 0x10c   :  { %v88_v51 = vmul.f32 %v285_v47, %v83_v46 }
 0x10d   :  { %v77_v45 = vsub.f32 1.5, %v76_v44 }
 0x10e   :  { %v93_v54 = vadd.f32 %v286_v52, %v88_v51 }
 0x10f   :  { %v78_v48 = vmul.f32 %v294_v39, %v77_v45 }
 0x111   :  { %v82_v49 = vsel %vm81_vm7, %v294_v39, %v78_v48 }
 0x112   :  { %v84_v50 = vmul.f32 %v82_v49, %v50_v19 }
 0x114   :  { %v89_v53 = vmul.f32 %v285_v47, %v84_v50 }
 0x116   :  { %v94_v55 = vadd.f32 %v286_v52, %v89_v53 }
 0x118   :  { %v95_v56 = vpack.c.bf16 %v94_v55, %v93_v54 }
 0x11a   :  { %237 = vmatmul.msk.bf16.vlgmr.msra.gmra.mxu0 %vm33_vm0, %v95_v56 }
 0x197   :  { %v128_v61 = vpop.f32.mrf.mxu0 }
 0x198   :  { %v129_v63 = vadd.f32 %v287_v62, %v128_v61 }
 0x19a   :  { %v133_v4 = vmax.f32 %v129_v63, 0.0 }
 0x19f   :  { %v130_v0 = vpop.f32.mrf.mxu0 }
 0x1a0   :  { %v131_v2 = vadd.f32 %v287_v62, %v130_v0 }
 0x1a2   :  { %v134_v5 = vmax.f32 %v131_v2, 0.0 }
 0x1a4   :  { %v135_v6 = vpack.c.bf16 %v134_v5, %v133_v4 }
 0x1a6   :  { %212 = vmatmul.bf16.vlgmr.msra.gmra.mxu1 %v135_v6 }
 0x223   :  { %v213_v8 = vpop.f32.mrf.mxu1 }
 0x224   :  { %v214_v9 = vadd.f32 %v288_v7, %v213_v8 }
 0x226   :  { %v218_v10 = vadd.f32 %v339_v1, %v214_v9 }
 0x228   :  { %v220_v11 = vpack.c.bf16 %v218_v10, %v218_v10 }
 0x22a   :  { %223 = vst.msk [vmem:[%s409_s7] sm:$0xf] %vm222_vm8, %v220_v11 }
 0x22b   :  { %v215_v12 = vpop.f32.mrf.mxu1 }
 0x22c   :  { %v216_v13 = vadd.f32 %v288_v7, %v215_v12 }
 0x22e   :  { %v219_v14 = vadd.f32 %v343_v3, %v216_v13 }
 0x230   :  { %v221_v15 = vpack.c.bf16 %v219_v14, %v219_v14 }
 0x232   :  { %224 = vst.msk [vmem:[%s409_s7 + $0x4] sm:$0xf] %vm222_vm8, %v221_v15 }

// kernel: token_decoder_forward.8
= control target key start
LH: loop header
LB: loop body
LE: loop exit
PB: predicated region body
PF: predicated region fallthrough
CT: control target
= control target key end

     0   :  { %s1015_s13 = smov 0   ;;  %s1120_s0 = inlined_call_operand.vmem [shape: bf16[2,8,32], index: 0, kind: input, shape index: {}]   ;;  %s1121_s1 = inlined_call_operand.vmem [shape: bf16[2,8,32], index: 1, kind: input, shape index: {}]   ;;  %s1122_s2 = inlined_call_operand.vmem [shape: f32[1,32], index: 2, kind: input, shape index: {}]   ;;  %s1123_s3 = inlined_call_operand.vmem [shape: f32[1,32], index: 3, kind: input, shape index: {}]   ;;  %s1124_s4 = inlined_call_operand.vmem [shape: bf16[32,32], index: 4, kind: input, shape index: {}]   ;;  %s1125_s5 = inlined_call_operand.vmem [shape: f32[1,32], index: 5, kind: input, shape index: {}]   ;;  %s1126_s6 = inlined_call_operand.vmem [shape: bf16[32,64], index: 6, kind: input, shape index: {}]   ;;  %s1127_s7 = inlined_call_operand.vmem [shape: f32[1,64], index: 7, kind: input, shape index: {}]   ;;  %s1128_s8 = inlined_call_operand.vmem [shape: bf16[32,32], index: 8, kind: input, shape index: {}]   ;;  %s1129_s9 = inlined_call_operand.vmem [shape: f32[1,32], index: 9, kind: input, shape index: {}]   ;;  %s1130_s10 = inlined_call_operand.vmem [shape: bf16[2,8,32], index: 10, kind: output, shape index: {}]  }
   0x1 LB: > { %s846_s14 = sadd.s32 4294967295, %s947_s13   ;;  %p850_p0 = scmp.ge.s32.totalorder %s947_s13, 1  ;;  %s947_s13 = sphi %s1015_s13, %s20_s13  }
   0x2   : > { %p320_p1 = scmp.lt.s32.totalorder %s947_s13, 3 }
   0x4   : > { %p321_p2 = pnand %p850_p0, %p320_p1 }
   0x5   : > { %p360_p3 = scmp.lt.s32.totalorder (!%p321_p2), %s846_s14, 1  ;;  %s951_s19 = smov (!%p321_p2), 120  }
   0x6   : > { %324 = sbr.rel (%p321_p2) target bundleno = 1619 (0x653), region = 60  ;;  %s952_s20 = smov (!%p321_p2), 104  }
   0x7   : > { %s953_s23 = smov (!%p321_p2), 112   ;;  %s954_s24 = smov (!%p321_p2), 88  }
   0x8   : > { %s956_s26 = smov (!%p321_p2), 72   ;;  %s957_s27 = smov (!%p321_p2), 8  }
   0x9   : > { %s958_s28 = smov (!%p321_p2), 16   ;;  %s959_s29 = smov (!%p321_p2), 24  }
   0xb   : > { %s1132_s14 = smov (!%p360_p3, %s846_s14), 1  ;;  %vm377_vm0 = vcmask 261120   ;;  %v949_v3 = vmov 32.0   ;;  %v894_v4 = vld [vmem:[%s1126_s6 + $0x8] sm:$0xff]  ;;  %v893_v16 = vld [vmem:[%s1126_s6] sm:$0xff]  ;;  %vm491_vm5 = vcmask 64512  }
   0xc   : > { %s1023_s15 = sshll.u32 %s1132_s14, 2  ;;  %921 = vrcp.f32 %v949_v3  ;;  %483 = vmatpush.bf16.msra.mxu1 %v894_v4  ;;  %v892_v18 = vld [vmem:[%s1124_s4 + $0x8] sm:$0xff]  ;;  %v891_v19 = vld [vmem:[%s1124_s4] sm:$0xff]  ;;  %vm532_vm6 = vcmask 1043456   ;;  %vm736_vm7 = vcmask 130048   ;;  %vm738_vm8 = vcmask 195584  }
   0xd   : > { %s363_s18 = scalar_lea.vmem %s1120_s0, %s1023_s15  ;;  %s367_s25 = scalar_lea.vmem %s1121_s1, %s1023_s15  ;;  %445 = vmatpush.bf16.msra.mxu0 %v892_v18  ;;  %v916_v29 = vld [vmem:[%s1122_s2] ss:$0 sm:$0xff]  ;;  %vm779_vm9 = vcmask 257024  }
   0xe   : > { %v373_v0 = vld [vmem:[%s363_s18] sm:$0xf]  ;;  %s950_s18 = smov 96  }
   0xf   : > { %v1029_v1 = vunpack.c.l.bf16 %v373_v0  ;;  %v453_v17 = vld [vmem:[%s367_s25] sm:$0xf]  ;;  %s955_s25 = smov 80  }
  0x10   : > { %484 = vmatpush.bf16.msra.mxu1 %v893_v16  ;;  %v917_v32 = vld [vmem:[%s1123_s3] ss:$0 sm:$0xff] }
  0x11   : > { %v378_v2 = vsel %vm377_vm0, %v1029_v1, 0.0  ;;  %446 = vmatpush.bf16.msra.mxu0 %v891_v19  ;;  %v918_v36 = vld [vmem:[%s1127_s7] ss:$0 sm:$0xff] }
  0x12   : > { %379 = vadd.xlane.f32.xlu0 %v378_v2  ;;  %v922_v5 = vpop.eup %921  ;;  %v919_v44 = vld [vmem:[%s1125_s5] ss:$0 sm:$0xff] }
  0x13   : > { %v382_v6 = vmul.f32 32.0, %v922_v5  ;;  %vm386_vm1 = vweird.f32 %v922_v5  ;;  %871 = vmatmul.msk.bf16.vlgmr.msra.gmra.mxu1 %vm377_vm0, %v453_v17 }
  0x15   : > { %v383_v7 = vsub.f32 1.0, %v382_v6 }
  0x17   : > { %v384_v8 = vmul.f32 %v922_v5, %v383_v7 }
  0x19   : > { %v385_v9 = vadd.f32 %v922_v5, %v384_v8 }
  0x1b   : > { %v387_v10 = vsel %vm386_vm1, %v922_v5, %v385_v9 }
  0x85   : > { %v380_v11 = vpop.xlane.xlu0 %379 }
  0x86   : > { %v388_v12 = vmul.f32 %v387_v10, %v380_v11 }
  0x88   : > { %v389_v13 = vsub.f32 %v1029_v1, %v388_v12 }
  0x8a   : > { %v390_v14 = vmul.f32 %v389_v13, %v389_v13 }
  0x8c   : > { %v391_v15 = vsel %vm377_vm0, %v390_v14, 0.0 }
  0x8d   : > { %392 = vadd.xlane.f32.xlu0 %v391_v15 }
  0x90   : > { %v486_v37 = vpop.f32.mrf.mxu1 }
  0x91   : > { %v487_v38 = vadd.f32 %v918_v36, %v486_v37 }
  0x93   : > { %v490_v39 = vpack.c.bf16 %v487_v38, %v487_v38 }
  0x95   : > { %v525_v40 = vunpack.c.l.b16 %v490_v39  ;;  %v496_v41 = vsel %vm491_vm5, %v490_v39, 0 }
  0x96   : > { %505 = vmatpush.bf16.xpose.msra.mxu2 %v496_v41 }
  0x97   : > { %v1063_v42 = vpack.c.b16 %v525_v40, %v525_v40 }
  0x98   : > { %v488_v43 = vpop.f32.mrf.mxu1 }
  0x99   : > { %527 = vrot.lane.b32.xlu2 %v1063_v42, %s950_s18 }
  0xa1   : > { %554 = vrot.lane.b32.xlu2 %v1063_v42, %s951_s19 }
  0xa9   : > { %668 = vrot.lane.b32.xlu2 %v1063_v42, %s952_s20 }
  0xf3   : > { %v528_v51 = vpop.permute.xlu2 %527 }
  0xf4   : > { %v534_v52 = vsel %vm532_vm6, %v528_v51, 0 }
  0xf5   : > { %543 = vmatpush.bf16.msra.mxu3 %v534_v52 }
  0xfb   : > { %v555_v53 = vpop.permute.xlu2 %554 }
  0xfc   : > { %v560_v54 = vsel %vm491_vm5, %v555_v53, 0 }
  0xfd   : > { %569 = vmatpush.bf16.xpose.msrb.mxu3 %v560_v54 }
 0x100   : > { %v393_v20 = vpop.xlane.xlu0 %392 }
 0x101   : > { %v394_v21 = vmul.f32 %v393_v20, %v387_v10 }
 0x103   : > { %v395_v22 = vadd.f32 1e-05, %v394_v21  ;;  %v669_v4 = vpop.permute.xlu2 %668 }
 0x104   : > { %v674_v6 = vsel %vm491_vm5, %v669_v4, 0 }
 0x105   : > { %923 = vrsqrt.f32 %v395_v22  ;;  %vm402_vm3 = vweird.f32 %v395_v22 }
 0x10b   : > { %v924_v23 = vpop.eup %923 }
 0x10c   : > { %v397_v24 = vmul.f32 %v924_v23, %v395_v22  ;;  %vm403_vm2 = vweird.f32 %v924_v23 }
 0x10d   : > { %vm404_vm4 = vmor %vm402_vm3, %vm403_vm2 }
 0x10e   : > { %v398_v25 = vmul.f32 %v924_v23, %v397_v24 }
 0x110   : > { %v399_v26 = vmul.f32 0.5, %v398_v25 }
 0x112   : > { %v400_v27 = vsub.f32 1.5, %v399_v26 }
 0x114   : > { %v401_v28 = vmul.f32 %v924_v23, %v400_v27 }
 0x116   : > { %v405_v30 = vsel %vm404_vm4, %v924_v23, %v401_v28 }
 0x117   : > { %v406_v31 = vmul.f32 %v405_v30, %v389_v13 }
 0x119   : > { %v410_v33 = vmul.f32 %v916_v29, %v406_v31 }
 0x11b   : > { %v414_v34 = vadd.f32 %v917_v32, %v410_v33 }
 0x11d   : > { %v415_v35 = vpack.c.bf16 %v414_v34, %v414_v34 }
 0x11f   : > { %862 = vmatmul.msk.bf16.vlgmr.msra.gmra.mxu0 %vm377_vm0, %v415_v35 }
 0x19c   : > { %v448_v45 = vpop.f32.mrf.mxu0 }
 0x19d   : > { %v449_v46 = vadd.f32 %v919_v44, %v448_v45 }
 0x19f   : > { %v452_v47 = vpack.c.bf16 %v449_v46, %v449_v46 }
 0x1a1   : > { %v550_v48 = vunpack.c.l.b16 %v452_v47  ;;  %872 = vmatmul.msk.bf16.vlgmr.msra.gmra.mxu2 %vm491_vm5, %v452_v47 }
 0x1a3   : > { %v551_v49 = vpack.c.b16 %v550_v48, %v550_v48 }
 0x1a4   : > { %v450_v50 = vpop.f32.mrf.mxu0 }
 0x1a5   : > { %609 = vrot.lane.b32.xlu2 %v551_v49, %s953_s23  ;;  %552 = vrot.lane.b32.xlu0 %v551_v49, %s951_s19 }
 0x1ad   : > { %666 = vrot.lane.b32.xlu2 %v551_v49, %s952_s20  ;;  %s371_s20 = scalar_lea.vmem %s1130_s10, %s1023_s15 }
 0x1ff   : > { %v610_v10 = vpop.permute.xlu2 %609 }
 0x207   : > { %v667_v11 = vpop.permute.xlu2 %666 }
 0x217   : > { %v553_v9 = vpop.permute.xlu0 %552 }
 0x224   : > { %v507_v55 = vpop.f32.mrf.mxu2 }
 0x225   : > { %v511_v56 = vmul.f32 0.35355338, %v507_v55 }
 0x227   : > { %v512_v57 = vsel %vm491_vm5, %v511_v56, -inf }
 0x228   : > { %513 = vmax.xlane.f32.xlu1 %v512_v57 }
 0x22c   : > { %v509_v58 = vpop.f32.mrf.mxu2 }
 0x29b   : > { %v514_v59 = vpop.xlane.xlu1 %513 }
 0x29c   : > { %v515_v60 = vsub.f32 %v511_v56, %v514_v59 }
 0x29e   : > { %v516_v61 = vmul.f32 1.442695, %v515_v60 }
 0x2a0   : > { %925 = vpow2.f32 %v516_v61 }
 0x2a6   : > { %v926_v62 = vpop.eup %925 }
 0x2a7   : > { %v518_v63 = vsel %vm491_vm5, %v926_v62, 0.0 }
 0x2a8   : > { %519 = vadd.xlane.f32.xlu1 %v518_v63 }
 0x2c1   : > { %611 = vrot.lane.b32.xlu1 %v1063_v42, %s953_s23 }
 0x31b   : > { %v520_v0 = vpop.xlane.xlu1 %519 }
 0x31c   : > { %927 = vrcp.f32 %v520_v0 }
 0x322   : > { %v928_v2 = vpop.eup %927 }
 0x323   : > { %v522_v3 = vmul.f32 %v928_v2, %v926_v62  ;;  %v896_v2 = vld [vmem:[%s1128_s8 + $0x8] sm:$0xff] }
 0x325   : > { %v523_v5 = vpack.c.bf16 %v522_v3, %v522_v3  ;;  %v895_v3 = vld [vmem:[%s1128_s8] sm:$0xff] }
 0x327   : > { %873 = vmatmul.msk.bf16.vlgmr.msra.gmra.mxu3 %vm491_vm5, %v523_v5 }
 0x328   : > { %683 = vmatpush.bf16.xpose.msra.mxu3 %v674_v6 }
 0x333   : > { %v612_v7 = vpop.permute.xlu1 %611 }
 0x334   : > { %v617_v8 = vsel %vm491_vm5, %v612_v7, 0 }
 0x335   : > { %626 = vmatpush.bf16.xpose.msrb.mxu1 %v617_v8 }
 0x337   : > { %874 = vmatmul.msk.bf16.vlgmr.msrb.gmra.mxu3 %vm491_vm5, %v553_v9 }
 0x33c   : > { %876 = vmatmul.msk.bf16.vlgmr.msrb.gmra.mxu1 %vm491_vm5, %v610_v10 }
 0x33d   : > { %770 = vmatpush.bf16.msra.mxu1 %v896_v2 }
 0x341   : > { %771 = vmatpush.bf16.msra.mxu1 %v895_v3 }
 0x347   : > { %878 = vmatmul.msk.bf16.vlgmr.msra.gmra.mxu3 %vm491_vm5, %v667_v11  ;;  %v920_v11 = vld [vmem:[%s1129_s9] ss:$0 sm:$0xff] }
 0x3aa   : > { %v1083_v12 = vpop.f32.mrf.mxu3 }
 0x3b2   : > { %v547_v13 = vpop.f32.mrf.mxu3 }
 0x3b9   : > { %v628_v14 = vpop.f32.mrf.mxu1 }
 0x3ba   : > { %v632_v15 = vmul.f32 0.35355338, %v628_v14  ;;  %v571_v16 = vpop.f32.mrf.mxu3 }
 0x3bb   : > { %v575_v17 = vmul.f32 0.35355338, %v571_v16 }
 0x3bc   : > { %v633_v18 = vsel %vm491_vm5, %v632_v15, -inf }
 0x3bd   : > { %634 = vmax.xlane.f32.xlu2 %v633_v18  ;;  %v576_v19 = vsel %vm491_vm5, %v575_v17, -inf }
 0x3be   : > { %577 = vmax.xlane.f32.xlu0 %v576_v19 }
 0x3c1   : > { %v630_v20 = vpop.f32.mrf.mxu1 }
 0x3c2   : > { %v573_v21 = vpop.f32.mrf.mxu3 }
 0x3ca   : > { %v685_v22 = vpop.f32.mrf.mxu3 }
 0x3cb   : > { %v689_v23 = vmul.f32 0.35355338, %v685_v22 }
 0x3cd   : > { %v690_v24 = vsel %vm491_vm5, %v689_v23, -inf }
 0x3ce   : > { %691 = vmax.xlane.f32.xlu1 %v690_v24 }
 0x3d2   : > { %v687_v25 = vpop.f32.mrf.mxu3 }
 0x3d5   : > { %588 = vrot.lane.b32.xlu2 %v1063_v42, %s954_s24 }
 0x430   : > { %v635_v26 = vpop.xlane.xlu2 %634 }
 0x431   : > { %v636_v27 = vsub.f32 %v632_v15, %v635_v26  ;;  %v578_v28 = vpop.xlane.xlu0 %577 }
 0x432   : > { %v579_v29 = vsub.f32 %v575_v17, %v578_v28 }
 0x433   : > { %v637_v30 = vmul.f32 1.442695, %v636_v27 }
 0x434   : > { %v580_v31 = vmul.f32 1.442695, %v579_v29 }
 0x435   : > { %929 = vpow2.f32 %v637_v30 }
 0x436   : > { %931 = vpow2.f32 %v580_v31 }
 0x438   : > { %v589_v32 = vpop.permute.xlu2 %588 }
 0x439   : > { %v594_v33 = vsel %vm532_vm6, %v589_v32, 0 }
 0x43a   : > { %603 = vmatpush.bf16.msrb.mxu0 %v594_v33 }
 0x43b   : > { %v930_v34 = vpop.eup %929 }
 0x43c   : > { %v932_v35 = vpop.eup %931  ;;  %v639_v36 = vsel %vm491_vm5, %v930_v34, 0.0 }
 0x43d   : > { %640 = vadd.xlane.f32.xlu1 %v639_v36  ;;  %v582_v37 = vsel %vm491_vm5, %v932_v35, 0.0 }
 0x43e   : > { %583 = vadd.xlane.f32.xlu0 %v582_v37 }
 0x441   : > { %v692_v38 = vpop.xlane.xlu1 %691 }
 0x442   : > { %v693_v39 = vsub.f32 %v689_v23, %v692_v38 }
 0x444   : > { %v694_v40 = vmul.f32 1.442695, %v693_v39 }
 0x446   : > { %933 = vpow2.f32 %v694_v40 }
 0x44c   : > { %v934_v41 = vpop.eup %933 }
 0x44d   : > { %v696_v43 = vsel %vm491_vm5, %v934_v41, 0.0 }
 0x44e   : > { %697 = vadd.xlane.f32.xlu0 %v696_v43 }
 0x456   : > { %645 = vrot.lane.b32.xlu1 %v1063_v42, %s955_s25 }
 0x462   : > { %702 = vrot.lane.b32.xlu0 %v1063_v42, %s956_s26 }
 0x4b0   : > { %v641_v47 = vpop.xlane.xlu1 %640 }
 0x4b1   : > { %v584_v44 = vpop.xlane.xlu0 %583 }
 0x4b2   : > { %935 = vrcp.f32 %v584_v44 }
 0x4b3   : > { %937 = vrcp.f32 %v641_v47 }
 0x4b8   : > { %v936_v45 = vpop.eup %935 }
 0x4b9   : > { %v586_v46 = vmul.f32 %v936_v45, %v932_v35  ;;  %v938_v49 = vpop.eup %937 }
 0x4ba   : > { %v643_v50 = vmul.f32 %v938_v49, %v930_v34 }
 0x4bb   : > { %v587_v48 = vpack.c.bf16 %v586_v46, %v586_v46 }
 0x4bc   : > { %v644_v54 = vpack.c.bf16 %v643_v50, %v643_v50 }
 0x4bd   : > { %875 = vmatmul.msk.bf16.vlgmr.msrb.gmra.mxu0 %vm491_vm5, %v587_v48 }
 0x4c1   : > { %v698_v51 = vpop.xlane.xlu0 %697 }
 0x4c2   : > { %939 = vrcp.f32 %v698_v51 }
 0x4c8   : > { %v646_v52 = vpop.permute.xlu1 %645  ;;  %v940_v42 = vpop.eup %939 }
 0x4c9   : > { %v651_v53 = vsel %vm532_vm6, %v646_v52, 0  ;;  %v700_v55 = vmul.f32 %v940_v42, %v934_v41 }
 0x4ca   : > { %660 = vmatpush.bf16.msrb.mxu2 %v651_v53 }
 0x4cb   : > { %v701_v58 = vpack.c.bf16 %v700_v55, %v700_v55 }
 0x4cd   : > { %877 = vmatmul.msk.bf16.vlgmr.msrb.gmra.mxu2 %vm491_vm5, %v644_v54 }
 0x4d4   : > { %v703_v56 = vpop.permute.xlu0 %702 }
 0x4d5   : > { %v708_v57 = vsel %vm532_vm6, %v703_v56, 0 }
 0x4d6   : > { %717 = vmatpush.bf16.msra.mxu0 %v708_v57 }
 0x4d9   : > { %879 = vmatmul.msk.bf16.vlgmr.msra.gmra.mxu0 %vm491_vm5, %v701_v58 }
 0x53a   : > { %v605_v59 = vpop.f32.mrf.mxu0 }
 0x53b   : > { %724 = vrot.lane.b32.xlu2 %v605_v59, %s957_s27 }
 0x542   : > { %v607_v60 = vpop.f32.mrf.mxu0 }
 0x550   : > { %v662_v61 = vpop.f32.mrf.mxu2 }
 0x551   : > { %728 = vrot.lane.b32.xlu2 %v662_v61, %s958_s28 }
 0x556   : > { %v719_v62 = vpop.f32.mrf.mxu0 }
 0x557   : > { %732 = vrot.lane.b32.xlu0 %v719_v62, %s959_s29 }
 0x558   : > { %v664_v63 = vpop.f32.mrf.mxu2 }
 0x55e   : > { %v721_v0 = vpop.f32.mrf.mxu0 }
 0x595   : > { %v725_v4 = vpop.permute.xlu2 %724 }
 0x596   : > { %v735_v6 = vsel %vm491_vm5, %v1083_v12, %v725_v4 }
 0x5ab   : > { %v729_v5 = vpop.permute.xlu2 %728 }
 0x5ac   : > { %v737_v7 = vsel %vm736_vm7, %v735_v6, %v729_v5 }
 0x5c9   : > { %v733_v8 = vpop.permute.xlu0 %732 }
 0x5ca   : > { %v739_v9 = vsel %vm738_vm8, %v737_v7, %v733_v8 }
 0x5cb   : > { %v740_v10 = vpack.c.bf16 %v739_v9, %v739_v9 }
 0x5cd   : > { %888 = vmatmul.msk.bf16.vlgmr.msra.gmra.mxu1 %vm377_vm0, %v740_v10 }
 0x64a   : > { %v773_v13 = vpop.f32.mrf.mxu1 }
 0x64b   : > { %v774_v14 = vadd.f32 %v920_v11, %v773_v13 }
 0x64d   : > { %v777_v15 = vadd.f32 %v774_v14, %v1029_v1 }
 0x64f   : > { %v778_v12 = vpack.c.bf16 %v777_v15, %v777_v15 }
 0x651   : > { %780 = vst.msk [vmem:[%s371_s20] sm:$0xf] %vm779_vm9, %v778_v12 }
 0x652   : > { %v775_v16 = vpop.f32.mrf.mxu1 }
 0x653 PF: > { %s20_s13 = sadd.s32 1, %s947_s13  }
 0x654   : > { %p17_p4 = scmp.ge.s32.totalorder %s20_s13, 4  }
 0x656   :  { %19 = sbr.rel (!%p17_p4) target bundleno = 1 (0x1), region = 93 }

</bundles_post_ra>
